<compile_context>
chip_gen: v6e
topology: v6e:2x2x1
jax: 0.10.0
libtpu: 0.0.40
codegen_flags: <defaults>
</compile_context>

<pallas_src>
import functools
import math

import jax
import jax.numpy as jnp
from jax.experimental import pallas as pl
from jax.experimental.pallas import tpu as pltpu

_MIB = 1024 * 1024
# Inputs with fewer read+write bytes than this run as a single block: the fixed
# ~0.35us per-grid-step overhead outweighs any pipelining / megacore win.
_SINGLE_BLOCK_IO_BYTES = 2 * _MIB
# Cap on the packed-path lane width lcm(feat, 128); wider feats use the general path.
_MAX_PACKED_LANES = 2048


def _hw_config():
    """Generation-aware VMEM / per-step-I/O targets (derived, not hard-coded)."""
    vmem_cap = 64 * _MIB                                   # conservative (v7x-sized) fallback
    try:
        vmem_cap = int(pltpu.get_tpu_info().vmem_capacity_bytes)
    except Exception:
        pass
    vmem_limit = min(int(vmem_cap * 0.65), 100 * _MIB)     # leave Mosaic scratch headroom
    tile_budget = min(int(vmem_cap * 0.40), 56 * _MIB)     # live double-buffered tiles
    # Per grid step we want (in+out) HBM bytes >= ~10x the ~0.35us step overhead at the
    # generation's HBM bandwidth: ~12 MB on v7x (~3.2 TB/s), ~6 MB on v5e/v6e.
    step_io_target = 12 * _MIB if vmem_cap <= 64 * _MIB else 6 * _MIB
    return vmem_limit, tile_budget, step_io_target


def _sublane_multiple(itemsize):
    # Keep row tiles a multiple of the sublane packing of the I/O dtype.
    if itemsize >= 4:
        return 8
    if itemsize == 2:
        return 16
    return 32


def _choose_row_tile(n_rows, lane, itemsize, tile_budget, step_io_target):
    """Byte-based row-tile choice.  Returns 0 if even `sub` rows overflow the VMEM
    budget (caller must switch to the feature-split path)."""
    sub = _sublane_multiple(itemsize)
    io_row = lane * itemsize * 2                       # HBM bytes per row (read + write)
    vmem_row = lane * (4 * itemsize + 4 * 4)           # 2x-buffered in+out + f32 temps
    max_tile = (tile_budget // vmem_row) // sub * sub
    if max_tile < sub:
        return 0                                       # needs feature-axis split
    if n_rows <= sub:
        return n_rows                                  # full-extent block is always legal
    total_io = n_rows * io_row
    if n_rows <= max_tile and total_io <= _SINGLE_BLOCK_IO_BYTES:
        return n_rows                                  # tiny input: one block is cheapest
    # Byte-targeted tile (amortizes per-step overhead), capped by the VMEM budget.
    tile = max(sub, min((step_io_target // io_row) // sub * sub, max_tile))
    # Keep >= 4 grid steps whenever there are enough rows: an even step count keeps
    # both v7x TensorCores busy and >= 3 steps overlaps writeback(i-1) with fetch(i+1).
    quarter = (n_rows // 4) // sub * sub
    if quarter >= sub:
        tile = min(tile, quarter)
    return min(tile, n_rows)


def _packed_layout(feat, n_rows):
    """Lane-dense packing for feat that is not a multiple of 128.

    Returns (lane, pack) with lane = lcm(feat, 128) and pack = lane // feat complete
    feature rows per packed lane row, or None if packing does not apply."""
    if feat % 128 == 0:
        return None                                    # already lane-dense
    lane = feat * 128 // math.gcd(feat, 128)           # lcm(feat, 128)
    if lane > _MAX_PACKED_LANES:
        return None
    pack = lane // feat
    if n_rows % pack != 0:
        return None
    return lane, pack


# ----------------------------------------------------------------------------- kernels


def _layernorm_kernel(x_ref, o_ref, *, eps):
    """General path: per-row mean/var over the lane axis, f32 accumulation.

    Two-pass centered variance on purpose (no E[x^2]-mean^2 cancellation); the extra
    reduce is fully hidden under the HBM stream on all generations."""
    x = x_ref[...].astype(jnp.float32)
    mean = jnp.mean(x, axis=-1, keepdims=True)
    centered = x - mean
    var = jnp.mean(centered * centered, axis=-1, keepdims=True)  # unbiased=False
    o_ref[...] = (centered * jax.lax.rsqrt(var + eps)).astype(o_ref.dtype)


def _layernorm_packed_kernel(x_ref, s_red_ref, s_bcast_ref, o_ref, *, feat, eps, precision):
    """Packed small-feature path.

    x_ref is (row_tile, L) with L = lcm(feat, 128); each lane row holds L//feat complete
    feature rows back-to-back, so loads/stores stay lane-dense (unmasked vst).  The
    segmented reduce + broadcast run as tiny one-hot matmuls on the otherwise idle MXU
    (separate 'vector extended' VLIW slot) instead of lane slices/concats on the XLU.
    s_red is (L, pack) one-hot (lane -> segment); s_bcast is its transpose (pack, L)."""
    x = x_ref[...].astype(jnp.float32)
    s_red = s_red_ref[...]
    s_bcast = s_bcast_ref[...]
    inv = 1.0 / float(feat)
    dot = functools.partial(jnp.dot, precision=precision,
                            preferred_element_type=jnp.float32)
    mean = dot(dot(x, s_red), s_bcast) * inv              # per-segment mean, broadcast to L
    centered = x - mean
    var = dot(dot(centered * centered, s_red), s_bcast) * inv
    o_ref[...] = (centered * jax.lax.rsqrt(var + eps)).astype(o_ref.dtype)


def _wide_stats_kernel(x_ref, mean_ref, rstd_ref, sum_sc, sq_sc, *, feat, feat_tile, eps):
    """Feature-split pass 1: accumulate per-row sum / sum-of-squares across feature
    blocks; finalize mean and 1/sqrt(var+eps) on the last feature block."""
    j = pl.program_id(1)

    @pl.when(j == 0)
    def _():
        sum_sc[...] = jnp.zeros_like(sum_sc)
        sq_sc[...] = jnp.zeros_like(sq_sc)

    x = x_ref[...].astype(jnp.float32)
    if feat % feat_tile != 0:
        # Mask out garbage lanes of the ragged final feature block.
        col = jax.lax.broadcasted_iota(jnp.int32, x.shape, 1) + j * feat_tile
        x = jnp.where(col < feat, x, 0.0)
    sum_sc[...] += jnp.sum(x, axis=-1, keepdims=True)
    sq_sc[...] += jnp.sum(x * x, axis=-1, keepdims=True)

    @pl.when(j == pl.num_programs(1) - 1)
    def _():
        inv = 1.0 / float(feat)
        mean = sum_sc[...] * inv
        var = jnp.maximum(sq_sc[...] * inv - mean * mean, 0.0)
        mean_ref[...] = mean
        rstd_ref[...] = jax.lax.rsqrt(var + eps)


def _wide_norm_kernel(x_ref, mean_ref, rstd_ref, o_ref):
    """Feature-split pass 2: stream x again and normalize with the per-row stats."""
    x = x_ref[...].astype(jnp.float32)
    o_ref[...] = ((x - mean_ref[...]) * rstd_ref[...]).astype(o_ref.dtype)


# ----------------------------------------------------------------------------- wrappers


def _call_rowwise(kernel, inputs, out_shape, row_tile, lane, extra_specs, vmem_limit):
    n_rows = out_shape.shape[0]
    grid = (pl.cdiv(n_rows, row_tile),)
    return pl.pallas_call(
        kernel,
        out_shape=out_shape,
        grid_spec=pltpu.PrefetchScalarGridSpec(
            num_scalar_prefetch=0,
            grid=grid,
            in_specs=[pl.BlockSpec((row_tile, lane), lambda i: (i, 0))] + extra_specs,
            out_specs=pl.BlockSpec((row_tile, lane), lambda i: (i, 0)),
        ),
        compiler_params=pltpu.CompilerParams(
            dimension_semantics=("parallel",),
            vmem_limit_bytes=vmem_limit,
        ),
    )(*inputs)


def _call_packed(x2d, feat, lane, pack, eps, row_tile, vmem_limit):
    """Packed lane-dense path; returns None if the MXU lowering is rejected."""
    rows2d = x2d.shape[0]
    seg = jnp.arange(lane, dtype=jnp.int32) // feat
    s_red = (seg[:, None] == jnp.arange(pack, dtype=jnp.int32)[None, :]).astype(jnp.float32)
    s_bcast = (jnp.arange(pack, dtype=jnp.int32)[:, None] == seg[None, :]).astype(jnp.float32)
    extra_specs = [pl.BlockSpec((lane, pack), lambda i: (0, 0)),
                   pl.BlockSpec((pack, lane), lambda i: (0, 0))]
    out_shape = jax.ShapeDtypeStruct((rows2d, lane), x2d.dtype)
    # HIGHEST keeps the one-hot sums exact in f32 even if the default f32 matmul were
    # demoted; if a toolchain rejects the precision attr, retry with the default.
    for precision in (jax.lax.Precision.HIGHEST, None):
        kernel = functools.partial(_layernorm_packed_kernel, feat=feat, eps=eps,
                                   precision=precision)
        try:
            return _call_rowwise(kernel, (x2d, s_red, s_bcast), out_shape,
                                 row_tile, lane, extra_specs, vmem_limit)
        except Exception:
            continue
    return None


def _choose_wide_tiles(n_rows, feat, itemsize, tile_budget, feat_tile=None):
    sub = _sublane_multiple(itemsize)
    per_elt = 4 * itemsize + 4                         # 2x-buffered in + out, + f32 temp share
    if feat_tile is None:
        feat_tile = (tile_budget // (sub * per_elt)) // 128 * 128
        feat_tile = min(max(feat_tile, 128), 32 * 1024)
    else:
        feat_tile = max(128, feat_tile // 128 * 128)
    if feat_tile >= feat:
        feat_tile = feat                               # single full-width feature block
    row_tile = max(sub, (tile_budget // (feat_tile * per_elt)) // sub * sub)
    if row_tile >= n_rows:
        row_tile = n_rows
    return row_tile, feat_tile


def _layer_normalize_wide(x2d, feat, eps, row_tile, feat_tile, vmem_limit):
    n_rows = x2d.shape[0]
    grid = (pl.cdiv(n_rows, row_tile), pl.cdiv(feat, feat_tile))
    stats_kernel = functools.partial(_wide_stats_kernel, feat=feat,
                                     feat_tile=feat_tile, eps=eps)
    mean, rstd = pl.pallas_call(
        stats_kernel,
        out_shape=(jax.ShapeDtypeStruct((n_rows, 1), jnp.float32),
                   jax.ShapeDtypeStruct((n_rows, 1), jnp.float32)),
        grid_spec=pltpu.PrefetchScalarGridSpec(
            num_scalar_prefetch=0,
            grid=grid,
            in_specs=[pl.BlockSpec((row_tile, feat_tile), lambda i, j: (i, j))],
            out_specs=[pl.BlockSpec((row_tile, 1), lambda i, j: (i, 0)),
                       pl.BlockSpec((row_tile, 1), lambda i, j: (i, 0))],
            scratch_shapes=[pltpu.VMEM((row_tile, 1), jnp.float32),
                            pltpu.VMEM((row_tile, 1), jnp.float32)],
        ),
        compiler_params=pltpu.CompilerParams(
            dimension_semantics=("parallel", "arbitrary"),
            vmem_limit_bytes=vmem_limit,
        ),
    )(x2d)
    return pl.pallas_call(
        _wide_norm_kernel,
        out_shape=jax.ShapeDtypeStruct(x2d.shape, x2d.dtype),
        grid_spec=pltpu.PrefetchScalarGridSpec(
            num_scalar_prefetch=0,
            grid=grid,
            in_specs=[pl.BlockSpec((row_tile, feat_tile), lambda i, j: (i, j)),
                      pl.BlockSpec((row_tile, 1), lambda i, j: (i, 0)),
                      pl.BlockSpec((row_tile, 1), lambda i, j: (i, 0))],
            out_specs=pl.BlockSpec((row_tile, feat_tile), lambda i, j: (i, j)),
        ),
        compiler_params=pltpu.CompilerParams(
            dimension_semantics=("parallel", "arbitrary"),
            vmem_limit_bytes=vmem_limit,
        ),
    )(x2d, mean, rstd)


def layer_normalize(x, eps=1e-5, *, feature_block=None):
    """LayerNormalize.forward: normalize over the last dim, no scale/bias.

    `feature_block` forces the feature-split path with the given feature block size
    (mostly for testing / tuning); by default it only engages when a few rows of the
    full feature dim no longer fit the VMEM budget."""
    orig_shape = x.shape
    feat = orig_shape[-1]
    n_rows = math.prod(orig_shape[:-1])
    itemsize = jnp.dtype(x.dtype).itemsize
    vmem_limit, tile_budget, step_io_target = _hw_config()

    # Row tile for the (n_rows, feat) layout; 0 => feature dim too wide for VMEM.
    general_tile = _choose_row_tile(n_rows, feat, itemsize, tile_budget, step_io_target)

    if feature_block is not None or general_tile == 0:
        x2d = x.reshape(n_rows, feat)
        row_tile, feat_tile = _choose_wide_tiles(n_rows, feat, itemsize, tile_budget,
                                                 feat_tile=feature_block)
        out = _layer_normalize_wide(x2d, feat, eps, row_tile, feat_tile, vmem_limit)
        return out.reshape(orig_shape)

    packed = _packed_layout(feat, n_rows)
    if packed is not None:
        lane, pack = packed
        rows2d = n_rows // pack
        x2d = x.reshape(rows2d, lane)                   # pure view reshape, no HBM copy
        row_tile = _choose_row_tile(rows2d, lane, itemsize, tile_budget, step_io_target)
        if row_tile > 0:
            out = _call_packed(x2d, feat, lane, pack, eps, row_tile, vmem_limit)
            if out is not None:
                return out.reshape(orig_shape)
        # fall through to the general path if the packed lowering was rejected

    x2d = x.reshape(n_rows, feat)
    out = _call_rowwise(
        functools.partial(_layernorm_kernel, eps=eps),
        (x2d,), jax.ShapeDtypeStruct((n_rows, feat), x.dtype),
        general_tile, feat, [], vmem_limit)
    return out.reshape(orig_shape)


def _reference(x, eps=1e-5):
    x32 = x.astype(jnp.float32)
    mean = jnp.mean(x32, axis=-1, keepdims=True)
    var = jnp.mean((x32 - mean) ** 2, axis=-1, keepdims=True)
    return ((x32 - mean) / jnp.sqrt(var + eps)).astype(x.dtype)


if __name__ == "__main__":
    key = jax.random.PRNGKey(0)
    eps = 1e-5

    # Small deterministic shapes that exercise every code path:
    #   (2, 8, 32)   packed lane-dense path (feature_size=32 as in the module)
    #   (4, 256)     general lane-dense path (feat multiple of 128)
    #   (4, 8, 96)   packed path for feat that does not divide 128 (lcm = 384)
    #   (3, 5, 96)   general fallback (rows not divisible by the packing factor)
    #   (1000, 384)  multi-step grid with a ragged final row block
    #   (48, 640)    forced feature-split path (ragged + masked feature block)
    #   (64, 256)    bf16 I/O dtype
    cases = [
        ((2, 8, 32), jnp.float32, None),
        ((4, 256), jnp.float32, None),
        ((4, 8, 96), jnp.float32, None),
        ((3, 5, 96), jnp.float32, None),
        ((1000, 384), jnp.float32, None),
        ((48, 640), jnp.float32, 256),
        ((64, 256), jnp.bfloat16, None),
    ]
    keys = jax.random.split(key, len(cases))
    for k, (shape, dtype, feature_block) in zip(keys, cases):
        x = jax.random.normal(k, shape, dtype=jnp.float32).astype(dtype)
        out = jax.block_until_ready(
            layer_normalize(x, eps=eps, feature_block=feature_block))
        ref = _reference(x, eps=eps)
        assert out.shape == x.shape and out.dtype == x.dtype
        tol = 1e-5 if dtype == jnp.float32 else 2e-2
        ok = jnp.allclose(out.astype(jnp.float32), ref.astype(jnp.float32),
                          atol=tol, rtol=tol)
        assert ok, f"mismatch vs reference for {shape} {dtype}"

    print("KERNEL_OK")
</pallas_src>

<mosaic_0001>
module attributes {stable_mosaic.version = 11 : i64} {
  func.func @_layernorm_packed_kernel(%arg0: i32, %arg1: memref<4x128xf32, #tpu.memory_space<vmem>>, %arg2: memref<128x4xf32, #tpu.memory_space<vmem>>, %arg3: memref<4x128xf32, #tpu.memory_space<vmem>>, %arg4: memref<4x128xf32, #tpu.memory_space<vmem>>) attributes {dimension_semantics = [#tpu.dimension_semantics<parallel>], iteration_bounds = array<i64: 1>, scalar_prefetch = 0 : i64, scratch_operands = 0 : i64, tpu.core_type = #tpu.core_type<tc>, window_params = [{transform_indices = @transform_0, window_bounds = array<i64: 4, 128>}, {pipeline_mode = #tpu.pipeline_mode<synchronous>, transform_indices = @transform_1, window_bounds = array<i64: 128, 4>}, {pipeline_mode = #tpu.pipeline_mode<synchronous>, transform_indices = @transform_2, window_bounds = array<i64: 4, 128>}, {transform_indices = @transform_3, window_bounds = array<i64: 4, 128>}]} {
    %c0 = arith.constant 0 : index
    %c0_0 = arith.constant 0 : index
    %0 = vector.load %arg1[%c0, %c0_0] : memref<4x128xf32, #tpu.memory_space<vmem>>, vector<4x128xf32>
    %c0_1 = arith.constant 0 : index
    %c0_2 = arith.constant 0 : index
    %1 = vector.load %arg2[%c0_1, %c0_2] : memref<128x4xf32, #tpu.memory_space<vmem>>, vector<128x4xf32>
    %c0_3 = arith.constant 0 : index
    %c0_4 = arith.constant 0 : index
    %2 = vector.load %arg3[%c0_3, %c0_4] : memref<4x128xf32, #tpu.memory_space<vmem>>, vector<4x128xf32>
    %cst = arith.constant dense<0.000000e+00> : vector<4x4xf32>
    %3 = tpu.matmul %0, %1, %cst {dimension_numbers = #tpu.dot_dimension_numbers<[1], [0], [0], [1], [0, 0, 1, 1], [], []>, precision = #tpu.contract_precision<fp32>} : vector<4x128xf32>, vector<128x4xf32>, vector<4x4xf32> -> vector<4x4xf32>
    %cst_5 = arith.constant dense<0.000000e+00> : vector<4x128xf32>
    %4 = tpu.matmul %3, %2, %cst_5 {dimension_numbers = #tpu.dot_dimension_numbers<[1], [0], [0], [1], [0, 0, 1, 1], [], []>, precision = #tpu.contract_precision<fp32>} : vector<4x4xf32>, vector<4x128xf32>, vector<4x128xf32> -> vector<4x128xf32>
    %cst_6 = arith.constant 3.125000e-02 : f32
    %5 = vector.broadcast %cst_6 : f32 to vector<4x128xf32>
    %6 = arith.mulf %4, %5 : vector<4x128xf32>
    %7 = arith.subf %0, %6 : vector<4x128xf32>
    %8 = arith.mulf %7, %7 : vector<4x128xf32>
    %cst_7 = arith.constant dense<0.000000e+00> : vector<4x4xf32>
    %9 = tpu.matmul %8, %1, %cst_7 {dimension_numbers = #tpu.dot_dimension_numbers<[1], [0], [0], [1], [0, 0, 1, 1], [], []>, precision = #tpu.contract_precision<fp32>} : vector<4x128xf32>, vector<128x4xf32>, vector<4x4xf32> -> vector<4x4xf32>
    %cst_8 = arith.constant dense<0.000000e+00> : vector<4x128xf32>
    %10 = tpu.matmul %9, %2, %cst_8 {dimension_numbers = #tpu.dot_dimension_numbers<[1], [0], [0], [1], [0, 0, 1, 1], [], []>, precision = #tpu.contract_precision<fp32>} : vector<4x4xf32>, vector<4x128xf32>, vector<4x128xf32> -> vector<4x128xf32>
    %cst_9 = arith.constant 3.125000e-02 : f32
    %11 = vector.broadcast %cst_9 : f32 to vector<4x128xf32>
    %12 = arith.mulf %10, %11 : vector<4x128xf32>
    %cst_10 = arith.constant 9.99999974E-6 : f32
    %13 = vector.broadcast %cst_10 : f32 to vector<4x128xf32>
    %14 = arith.addf %12, %13 : vector<4x128xf32>
    %15 = math.rsqrt %14 : vector<4x128xf32>
    %16 = arith.mulf %7, %15 : vector<4x128xf32>
    %c0_11 = arith.constant 0 : index
    %c0_12 = arith.constant 0 : index
    %17 = vector.load %arg4[%c0_11, %c0_12] : memref<4x128xf32, #tpu.memory_space<vmem>>, vector<4x128xf32>
    tpu.vector_store %arg4[%c0_11, %c0_12], %16 {strides = array<i32>} : memref<4x128xf32, #tpu.memory_space<vmem>>, vector<4x128xf32>,
    return
  }
  func.func @transform_0(%arg0: i32) -> (i32, i32) {
    %c0_i32 = arith.constant 0 : i32
    %c0_i32_0 = arith.constant 0 : i32
    return %arg0, %c0_i32 : i32, i32
  }
  func.func @transform_1(%arg0: i32) -> (i32, i32) {
    %c0_i32 = arith.constant 0 : i32
    %c0_i32_0 = arith.constant 0 : i32
    %c0_i32_1 = arith.constant 0 : i32
    return %c0_i32, %c0_i32_0 : i32, i32
  }
  func.func @transform_2(%arg0: i32) -> (i32, i32) {
    %c0_i32 = arith.constant 0 : i32
    %c0_i32_0 = arith.constant 0 : i32
    %c0_i32_1 = arith.constant 0 : i32
    return %c0_i32, %c0_i32_0 : i32, i32
  }
  func.func @transform_3(%arg0: i32) -> (i32, i32) {
    %c0_i32 = arith.constant 0 : i32
    %c0_i32_0 = arith.constant 0 : i32
    return %arg0, %c0_i32 : i32, i32
  }
}

module attributes {stable_mosaic.version = 11 : i64} {
  func.func @_layernorm_packed_kernel(%arg0: i32, %arg1: memref<4x128xf32, #tpu.memory_space<vmem>>, %arg2: memref<128x4xf32, #tpu.memory_space<vmem>>, %arg3: memref<4x128xf32, #tpu.memory_space<vmem>>, %arg4: memref<4x128xf32, #tpu.memory_space<vmem>>) attributes {dimension_semantics = [#tpu.dimension_semantics<parallel>], iteration_bounds = array<i64: 1>, scalar_prefetch = 0 : i64, scratch_operands = 0 : i64, tpu.core_type = #tpu.core_type<tc>, window_params = [{transform_indices = @transform_0, window_bounds = array<i64: 4, 128>}, {pipeline_mode = #tpu.pipeline_mode<synchronous>, transform_indices = @transform_1, window_bounds = array<i64: 128, 4>}, {pipeline_mode = #tpu.pipeline_mode<synchronous>, transform_indices = @transform_2, window_bounds = array<i64: 4, 128>}, {transform_indices = @transform_3, window_bounds = array<i64: 4, 128>}]} {
    %c0 = arith.constant 0 : index
    %c0_0 = arith.constant 0 : index
    %0 = vector.load %arg1[%c0, %c0_0] : memref<4x128xf32, #tpu.memory_space<vmem>>, vector<4x128xf32>
    %c0_1 = arith.constant 0 : index
    %c0_2 = arith.constant 0 : index
    %1 = vector.load %arg2[%c0_1, %c0_2] : memref<128x4xf32, #tpu.memory_space<vmem>>, vector<128x4xf32>
    %c0_3 = arith.constant 0 : index
    %c0_4 = arith.constant 0 : index
    %2 = vector.load %arg3[%c0_3, %c0_4] : memref<4x128xf32, #tpu.memory_space<vmem>>, vector<4x128xf32>
    %cst = arith.constant dense<0.000000e+00> : vector<4x4xf32>
    %3 = tpu.matmul %0, %1, %cst {dimension_numbers = #tpu.dot_dimension_numbers<[1], [0], [0], [1], [0, 0, 1, 1], [], []>} : vector<4x128xf32>, vector<128x4xf32>, vector<4x4xf32> -> vector<4x4xf32>
    %cst_5 = arith.constant dense<0.000000e+00> : vector<4x128xf32>
    %4 = tpu.matmul %3, %2, %cst_5 {dimension_numbers = #tpu.dot_dimension_numbers<[1], [0], [0], [1], [0, 0, 1, 1], [], []>} : vector<4x4xf32>, vector<4x128xf32>, vector<4x128xf32> -> vector<4x128xf32>
    %cst_6 = arith.constant 3.125000e-02 : f32
    %5 = vector.broadcast %cst_6 : f32 to vector<4x128xf32>
    %6 = arith.mulf %4, %5 : vector<4x128xf32>
    %7 = arith.subf %0, %6 : vector<4x128xf32>
    %8 = arith.mulf %7, %7 : vector<4x128xf32>
    %cst_7 = arith.constant dense<0.000000e+00> : vector<4x4xf32>
    %9 = tpu.matmul %8, %1, %cst_7 {dimension_numbers = #tpu.dot_dimension_numbers<[1], [0], [0], [1], [0, 0, 1, 1], [], []>} : vector<4x128xf32>, vector<128x4xf32>, vector<4x4xf32> -> vector<4x4xf32>
    %cst_8 = arith.constant dense<0.000000e+00> : vector<4x128xf32>
    %10 = tpu.matmul %9, %2, %cst_8 {dimension_numbers = #tpu.dot_dimension_numbers<[1], [0], [0], [1], [0, 0, 1, 1], [], []>} : vector<4x4xf32>, vector<4x128xf32>, vector<4x128xf32> -> vector<4x128xf32>
    %cst_9 = arith.constant 3.125000e-02 : f32
    %11 = vector.broadcast %cst_9 : f32 to vector<4x128xf32>
    %12 = arith.mulf %10, %11 : vector<4x128xf32>
    %cst_10 = arith.constant 9.99999974E-6 : f32
    %13 = vector.broadcast %cst_10 : f32 to vector<4x128xf32>
    %14 = arith.addf %12, %13 : vector<4x128xf32>
    %15 = math.rsqrt %14 : vector<4x128xf32>
    %16 = arith.mulf %7, %15 : vector<4x128xf32>
    %c0_11 = arith.constant 0 : index
    %c0_12 = arith.constant 0 : index
    %17 = vector.load %arg4[%c0_11, %c0_12] : memref<4x128xf32, #tpu.memory_space<vmem>>, vector<4x128xf32>
    tpu.vector_store %arg4[%c0_11, %c0_12], %16 {strides = array<i32>} : memref<4x128xf32, #tpu.memory_space<vmem>>, vector<4x128xf32>,
    return
  }
  func.func @transform_0(%arg0: i32) -> (i32, i32) {
    %c0_i32 = arith.constant 0 : i32
    %c0_i32_0 = arith.constant 0 : i32
    return %arg0, %c0_i32 : i32, i32
  }
  func.func @transform_1(%arg0: i32) -> (i32, i32) {
    %c0_i32 = arith.constant 0 : i32
    %c0_i32_0 = arith.constant 0 : i32
    %c0_i32_1 = arith.constant 0 : i32
    return %c0_i32, %c0_i32_0 : i32, i32
  }
  func.func @transform_2(%arg0: i32) -> (i32, i32) {
    %c0_i32 = arith.constant 0 : i32
    %c0_i32_0 = arith.constant 0 : i32
    %c0_i32_1 = arith.constant 0 : i32
    return %c0_i32, %c0_i32_0 : i32, i32
  }
  func.func @transform_3(%arg0: i32) -> (i32, i32) {
    %c0_i32 = arith.constant 0 : i32
    %c0_i32_0 = arith.constant 0 : i32
    return %arg0, %c0_i32 : i32, i32
  }
}

module attributes {stable_mosaic.version = 11 : i64} {
  func.func @_layernorm_kernel(%arg0: i32, %arg1: memref<16x32xf32, #tpu.memory_space<vmem>>, %arg2: memref<16x32xf32, #tpu.memory_space<vmem>>) attributes {dimension_semantics = [#tpu.dimension_semantics<parallel>], iteration_bounds = array<i64: 1>, scalar_prefetch = 0 : i64, scratch_operands = 0 : i64, tpu.core_type = #tpu.core_type<tc>, window_params = [{transform_indices = @transform_0, window_bounds = array<i64: 16, 32>}, {transform_indices = @transform_1, window_bounds = array<i64: 16, 32>}]} {
    %c0 = arith.constant 0 : index
    %c0_0 = arith.constant 0 : index
    %0 = vector.load %arg1[%c0, %c0_0] : memref<16x32xf32, #tpu.memory_space<vmem>>, vector<16x32xf32>
    %cst = arith.constant dense<0.000000e+00> : vector<16xf32>
    %1 = vector.multi_reduction <add>, %0, %cst [1] : vector<16x32xf32> to vector<16xf32>
    %2 = vector.shape_cast %1 : vector<16xf32> to vector<16x1xf32>
    %cst_1 = arith.constant 3.200000e+01 : f32
    %3 = vector.broadcast %cst_1 : f32 to vector<16x1xf32>
    %4 = arith.divf %2, %3 : vector<16x1xf32>
    %5 = vector.broadcast %4 : vector<16x1xf32> to vector<16x32xf32>
    %6 = arith.subf %0, %5 : vector<16x32xf32>
    %7 = arith.mulf %6, %6 : vector<16x32xf32>
    %cst_2 = arith.constant dense<0.000000e+00> : vector<16xf32>
    %8 = vector.multi_reduction <add>, %7, %cst_2 [1] : vector<16x32xf32> to vector<16xf32>
    %9 = vector.shape_cast %8 : vector<16xf32> to vector<16x1xf32>
    %cst_3 = arith.constant 3.200000e+01 : f32
    %10 = vector.broadcast %cst_3 : f32 to vector<16x1xf32>
    %11 = arith.divf %9, %10 : vector<16x1xf32>
    %cst_4 = arith.constant 9.99999974E-6 : f32
    %12 = vector.broadcast %cst_4 : f32 to vector<16x1xf32>
    %13 = arith.addf %11, %12 : vector<16x1xf32>
    %14 = math.rsqrt %13 : vector<16x1xf32>
    %15 = vector.broadcast %14 : vector<16x1xf32> to vector<16x32xf32>
    %16 = arith.mulf %6, %15 : vector<16x32xf32>
    %c0_5 = arith.constant 0 : index
    %c0_6 = arith.constant 0 : index
    %17 = vector.load %arg2[%c0_5, %c0_6] : memref<16x32xf32, #tpu.memory_space<vmem>>, vector<16x32xf32>
    tpu.vector_store %arg2[%c0_5, %c0_6], %16 {strides = array<i32>} : memref<16x32xf32, #tpu.memory_space<vmem>>, vector<16x32xf32>,
    return
  }
  func.func @transform_0(%arg0: i32) -> (i32, i32) {
    %c0_i32 = arith.constant 0 : i32
    %c0_i32_0 = arith.constant 0 : i32
    return %arg0, %c0_i32 : i32, i32
  }
  func.func @transform_1(%arg0: i32) -> (i32, i32) {
    %c0_i32 = arith.constant 0 : i32
    %c0_i32_0 = arith.constant 0 : i32
    return %arg0, %c0_i32 : i32, i32
  }
}

</mosaic_0001>

<bundles_post_ra>
// kernel: tpu_custom_call.1
= control target key start
LH: loop header
LB: loop body
LE: loop exit
PB: predicated region body
PF: predicated region fallthrough
CT: control target
= control target key end

     0   :  { %v3780_v3 = vmov 0.0   ;;  %vm2976_vm0 = vmmov 0   ;;  %s3753_s0 = inlined_call_operand.vmem [shape: f32[4,128], index: 0, kind: input, shape index: {}]   ;;  %s3754_s1 = inlined_call_operand.vmem [shape: f32[128,4], index: 1, kind: input, shape index: {}]   ;;  %s3755_s2 = inlined_call_operand.vmem [shape: f32[4,128], index: 2, kind: input, shape index: {}]   ;;  %s3756_s3 = inlined_call_operand.hbm [shape: f32[4,128], index: 3, kind: output, shape index: {}]  }
   0x1   :  { %v31_v0 = vld [vmem:[%s3754_s1 + $0x78] sm:$0xff]  ;;  %v30_v1 = vld [vmem:[%s3754_s1 + $0x70] sm:$0xff]  ;;  %v29_v2 = vld [vmem:[%s3754_s1 + $0x68] sm:$0xff]  ;;  %2468 = vmatprep.subr.mxu0 %v3780_v3  ;;  %2503 = vmatprep.subr.mxu1 %v3780_v3 }
   0x2   :  { %v3008_v4 = vand.u32 4294901760, %v31_v0  ;;  %v3010_v5 = vand.u32 4294901760, %v30_v1  ;;  %v3012_v6 = vand.u32 4294901760, %v29_v2  ;;  %v28_v7 = vld [vmem:[%s3754_s1 + $0x60] sm:$0xff]  ;;  %v27_v8 = vld [vmem:[%s3754_s1 + $0x58] sm:$0xff]  ;;  %v26_v9 = vld [vmem:[%s3754_s1 + $0x50] sm:$0xff]  ;;  %2500 = vmatprep.mubr.msk.f32.mxu0 %vm2976_vm0, %v3780_v3  ;;  %2535 = vmatprep.mubr.msk.f32.mxu1 %vm2976_vm0, %v3780_v3 }
   0x3   :  { %v3024_v10 = vand.u32 4294901760, %v28_v7  ;;  %v3026_v11 = vand.u32 4294901760, %v27_v8  ;;  %v3028_v12 = vand.u32 4294901760, %v26_v9  ;;  %v25_v13 = vld [vmem:[%s3754_s1 + $0x48] sm:$0xff]  ;;  %v24_v14 = vld [vmem:[%s3754_s1 + $0x40] sm:$0xff]  ;;  %v23_v19 = vld [vmem:[%s3754_s1 + $0x38] sm:$0xff] }
   0x4   :  { %2469 = vmatpush3.msra.mxu0 %v3008_v4  ;;  %v3042_v15 = vsub.f32 %v31_v0, %v3008_v4  ;;  %v3045_v16 = vsub.f32 %v30_v1, %v3010_v5  ;;  %v3047_v17 = vand.u32 4294901760, %v25_v13  ;;  %v3050_v18 = vsub.f32 %v29_v2, %v3012_v6  ;;  %v22_v26 = vld [vmem:[%s3754_s1 + $0x30] sm:$0xff] }
   0x5   :  { %2470 = vmatprep.subr.mxu0 %v3780_v3  ;;  %v3057_v20 = vsub.f32 %v28_v7, %v3024_v10  ;;  %v3060_v21 = vsub.f32 %v27_v8, %v3026_v11  ;;  %v3072_v25 = vand.u32 4294901760, %v24_v14  ;;  %v3081_v28 = vand.u32 4294901760, %v23_v19 }
   0x6   :  { %2471 = vmatpush3.msra.mxu0 %v3010_v5  ;;  %v3064_v22 = vand.u32 4294901760, %v3042_v15  ;;  %v3067_v23 = vand.u32 4294901760, %v3045_v16  ;;  %v3070_v24 = vand.u32 4294901760, %v3050_v18  ;;  %v3087_v30 = vsub.f32 %v26_v9, %v3028_v12 }
   0x7   :  { %2472 = vmatprep.subr.mxu0 %v3780_v3  ;;  %v3079_v27 = vand.u32 4294901760, %v3057_v20  ;;  %v3084_v29 = vand.u32 4294901760, %v3060_v21  ;;  %v3097_v34 = vsub.f32 %v25_v13, %v3047_v17 }
   0x8   :  { %3783 = vst [vmem:[#allocation5_spill] sm:$0xff] %v3067_v23  ;;  %3784 = vst [vmem:[#allocation6_spill] sm:$0xff] %v3070_v24  ;;  %2473 = vmatpush3.msra.mxu0 %v3012_v6  ;;  %v128_v31 = vsub.f32 %v3042_v15, %v3064_v22  ;;  %v135_v32 = vsub.f32 %v3045_v16, %v3067_v23  ;;  %v142_v33 = vsub.f32 %v3050_v18, %v3070_v24 }
   0x9   :  { %3785 = vst [vmem:[#allocation7_spill] sm:$0xff] %v3079_v27  ;;  %3786 = vst [vmem:[#allocation8_spill] sm:$0xff] %v3084_v29 }
   0xa   :  { %8 = vsyncpa [#allocation3], 0  ;;  %2474 = vmatprep.subr.mxu0 %v3780_v3  ;;  %v3100_v35 = vand.u32 4294901760, %v22_v26  ;;  %v21_v36 = vld [vmem:[%s3754_s1 + $0x28] sm:$0xff]  ;;  %v3106_v37 = vand.u32 4294901760, %v128_v31  ;;  %v3108_v38 = vand.u32 4294901760, %v135_v32  ;;  %v149_v39 = vsub.f32 %v3057_v20, %v3079_v27 }
   0xb   :  { %2475 = vmatpush3.msra.mxu0 %v3024_v10  ;;  %v3113_v40 = vand.u32 4294901760, %v3087_v30  ;;  %v20_v41 = vld [vmem:[%s3754_s1 + $0x20] sm:$0xff]  ;;  %v156_v42 = vsub.f32 %v3060_v21, %v3084_v29  ;;  %v3122_v43 = vsub.f32 %v24_v14, %v3072_v25  ;;  %v3126_v44 = vand.u32 4294901760, %v142_v33  ;;  %v19_v49 = vld [vmem:[%s3754_s1 + $0x18] sm:$0xff]  ;;  %v18_v54 = vld [vmem:[%s3754_s1 + $0x10] sm:$0xff] }
   0xc   :  { %2476 = vmatprep.subr.mxu0 %v3780_v3  ;;  %2504 = vmatpush3.msra.mxu1 %v3106_v37  ;;  %v3128_v45 = vand.u32 4294901760, %v21_v36  ;;  %v3131_v46 = vand.u32 4294901760, %v3097_v34  ;;  %v3134_v47 = vsub.f32 %v23_v19, %v3081_v28  ;;  %v3138_v48 = vand.u32 4294901760, %v20_v41  ;;  %v3146_v50 = vld [vmem:[%s3753_s0] sm:$0xf]  ;;  %v17_v60 = vld [vmem:[%s3754_s1 + $0x8] sm:$0xff] }
   0xd   :  { %3787 = vst [vmem:[#allocation9_spill] sm:$0xff] %v3113_v40  ;;  %2477 = vmatpush3.msra.mxu0 %v3026_v11  ;;  %2505 = vmatprep.subr.mxu1 %v3780_v3  ;;  %3789 = vst [vmem:[#allocation11_spill] sm:$0xff] %v3146_v50  ;;  %v3150_v51 = vand.u32 4294901760, %v149_v39  ;;  %v163_v52 = vsub.f32 %v3087_v30, %v3113_v40  ;;  %v3155_v53 = vand.u32 4294901760, %v3122_v43  ;;  %v3165_v56 = vand.u32 4294901760, %v156_v42  ;;  %v16_v7 = vld [vmem:[%s3754_s1] sm:$0xff] }
   0xe   :  { %3788 = vst [vmem:[#allocation10_spill] sm:$0xff] %v3131_v46  ;;  %2478 = vmatprep.subr.mxu0 %v3780_v3  ;;  %2506 = vmatpush3.msra.mxu1 %v3108_v38  ;;  %v3161_v55 = vsub.f32 %v22_v26, %v3100_v35  ;;  %v3168_v57 = vand.u32 4294901760, %v3134_v47  ;;  %v170_v58 = vsub.f32 %v3097_v34, %v3131_v46  ;;  %v3174_v59 = vand.u32 4294901760, %v19_v49 }
   0xf   :  { %2479 = vmatpush3.msra.mxu0 %v3028_v12  ;;  %3790 = vst [vmem:[#allocation12_spill] sm:$0xff] %v3150_v51  ;;  %3791 = vst [vmem:[#allocation13_spill] sm:$0xff] %v3155_v53  ;;  %2507 = vmatprep.subr.mxu1 %v3780_v3  ;;  %v3180_v61 = vsub.f32 %v21_v36, %v3128_v45  ;;  %v3183_v62 = vand.u32 4294901760, %v3146_v50  ;;  %v3187_v63 = vand.u32 4294901760, %v18_v54  ;;  %v3191_v0 = vand.u32 4294901760, %v163_v52 }
  0x10   :  { %2480 = vmatprep.subr.mxu0 %v3780_v3  ;;  %3792 = vst [vmem:[#allocation14_spill] sm:$0xff] %v3165_v56  ;;  %3793 = vst [vmem:[#allocation15_spill] sm:$0xff] %v3168_v57  ;;  %2508 = vmatpush3.msra.mxu1 %v3126_v44  ;;  %v177_v1 = vsub.f32 %v3122_v43, %v3155_v53  ;;  %v3196_v2 = vand.u32 4294901760, %v3161_v55  ;;  %v3202_v8 = vsub.f32 %v20_v41, %v3138_v48  ;;  %vm678_vm1 = vcmask 1043456  }
  0x11   :  { %2481 = vmatpush3.msra.mxu0 %v3047_v17  ;;  %2509 = vmatprep.subr.mxu1 %v3780_v3  ;;  %3794 = vst [vmem:[#allocation16_spill] sm:$0xff] %v3191_v0  ;;  %v184_v9 = vsub.f32 %v3134_v47, %v3168_v57  ;;  %v3208_v13 = vand.u32 4294901760, %v17_v60  ;;  %v3212_v14 = vand.u32 4294901760, %v170_v58  ;;  %v3215_v19 = vand.u32 4294901760, %v3180_v61 }
  0x12   :  { %2482 = vmatprep.subr.mxu0 %v3780_v3  ;;  %2510 = vmatpush3.msra.mxu1 %v3150_v51  ;;  %3795 = vst [vmem:[#allocation17_spill] sm:$0xff] %v3196_v2  ;;  %v3219_v26 = vsub.f32 %v3146_v50, %v3183_v62  ;;  %v3222_v31 = vsub.f32 %v19_v49, %v3174_v59  ;;  %v3226_v32 = vand.u32 4294901760, %v16_v7  ;;  %v3230_v33 = vand.u32 4294901760, %v177_v1 }
  0x13   :  { %2483 = vmatpush3.msra.mxu0 %v3072_v25  ;;  %2511 = vmatprep.subr.mxu1 %v3780_v3  ;;  %3796 = vst [vmem:[#allocation18_spill] sm:$0xff] %v3212_v14  ;;  %3797 = vst [vmem:[#allocation19_spill] sm:$0xff] %v3215_v19  ;;  %v191_v36 = vsub.f32 %v3161_v55, %v3196_v2  ;;  %v3235_v39 = vand.u32 4294901760, %v3202_v8  ;;  %v3238_v41 = vsub.f32 %v18_v54, %v3187_v63  ;;  %vm674_vm2 = vcmask 31744  }
  0x14   :  { %2484 = vmatprep.subr.mxu0 %v3780_v3  ;;  %2512 = vmatpush3.msra.mxu1 %v3165_v56  ;;  %3798 = vst [vmem:[#allocation20_spill] sm:$0xff] %v3230_v33  ;;  %v3242_v42 = vand.u32 4294901760, %v184_v9  ;;  %v198_v49 = vsub.f32 %v3180_v61, %v3215_v19  ;;  %v3250_v58 = vand.u32 4294901760, %v3222_v31  ;;  %v3253_v54 = vsub.f32 %v17_v60, %v3208_v13 }
  0x15   :  { %2485 = vmatpush3.msra.mxu0 %v3081_v28  ;;  %2513 = vmatprep.subr.mxu1 %v3780_v3  ;;  %3799 = vst [vmem:[#allocation21_spill] sm:$0xff] %v3235_v39  ;;  %v3259_v1 = vand.u32 4294901760, %v191_v36  ;;  %v205_v9 = vsub.f32 %v3202_v8, %v3235_v39  ;;  %v3264_v52 = vand.u32 4294901760, %v3238_v41  ;;  %v3267_v50 = vsub.f32 %v16_v7, %v3226_v32 }
  0x16   :  { %2486 = vmatprep.subr.mxu0 %v3780_v3  ;;  %2514 = vmatpush3.msra.mxu1 %v3191_v0  ;;  %3800 = vst [vmem:[#allocation22_spill] sm:$0xff] %v3242_v42  ;;  %3801 = vst [vmem:[#allocation23_spill] sm:$0xff] %v3250_v58  ;;  %v3273_v60 = vand.u32 4294901760, %v198_v49  ;;  %v3804_v36 = vand.u32 4294901760, %v3219_v26  ;;  %v3281_v7 = vand.u32 4294901760, %v3253_v54 }
  0x17   :  { %2487 = vmatpush3.msra.mxu0 %v3100_v35  ;;  %2515 = vmatprep.subr.mxu1 %v3780_v3  ;;  %3802 = vst [vmem:[#allocation24_spill] sm:$0xff] %v3259_v1  ;;  %3803 = vst [vmem:[#allocation25_spill] sm:$0xff] %v3264_v52  ;;  %v3287_v49 = vand.u32 4294901760, %v205_v9 }
  0x18   :  { %2488 = vmatprep.subr.mxu0 %v3780_v3  ;;  %2516 = vmatpush3.msra.mxu1 %v3212_v14  ;;  %v212_v14 = vsub.f32 %v3222_v31, %v3250_v58  ;;  %3805 = vst [vmem:[#allocation26_spill] sm:$0xff] %v3281_v7  ;;  %v226_v9 = vsub.f32 %v3253_v54, %v3281_v7 }
  0x19   :  { %2489 = vmatpush3.msra.mxu0 %v3128_v45  ;;  %2517 = vmatprep.subr.mxu1 %v3780_v3 }
  0x1a   :  { %2490 = vmatprep.subr.mxu0 %v3780_v3  ;;  %2518 = vmatpush3.msra.mxu1 %v3230_v33  ;;  %v117_v33 = vsub.f32 %v3219_v26, %v3804_v36  ;;  %v3292_v36 = vand.u32 4294901760, %v3267_v50  ;;  %v3298_v56 = vand.u32 4294901760, %v212_v14  ;;  %v3313_v14 = vand.u32 4294901760, %v226_v9 }
  0x1b   :  { %2491 = vmatpush3.msra.mxu0 %v3138_v48  ;;  %2519 = vmatprep.subr.mxu1 %v3780_v3 }
  0x1c   :  { %2492 = vmatprep.subr.mxu0 %v3780_v3  ;;  %2520 = vmatpush3.msra.mxu1 %v3242_v42  ;;  %v219_v42 = vsub.f32 %v3238_v41, %v3264_v52  ;;  %3806 = vst [vmem:[#allocation27_spill] sm:$0xff] %v3292_v36  ;;  %v118_v0 = vand.u32 4294901760, %v117_v33  ;;  %v233_v51 = vsub.f32 %v3267_v50, %v3292_v36 }
  0x1d   :  { %2493 = vmatpush3.msra.mxu0 %v3174_v59  ;;  %2521 = vmatprep.subr.mxu1 %v3780_v3 }
  0x1e   :  { %2494 = vmatprep.subr.mxu0 %v3780_v3  ;;  %2522 = vmatpush3.msra.mxu1 %v3259_v1  ;;  %v3306_v1 = vand.u32 4294901760, %v219_v42  ;;  %v3319_v33 = vand.u32 4294901760, %v233_v51  ;;  %v3807_v51 = vand.u32 4294901760, %v3219_v26 }
  0x1f   :  { %2495 = vmatpush3.msra.mxu0 %v3187_v63  ;;  %2523 = vmatprep.subr.mxu1 %v3780_v3 }
  0x20   :  { %2496 = vmatprep.subr.mxu0 %v3780_v3  ;;  %2524 = vmatpush3.msra.mxu1 %v3273_v60 }
  0x21   :  { %2497 = vmatpush3.msra.mxu0 %v3208_v13  ;;  %2525 = vmatprep.subr.mxu1 %v3780_v3 }
  0x22   :  { %2498 = vmatprep.subr.mxu0 %v3780_v3  ;;  %2526 = vmatpush3.msra.mxu1 %v3287_v49 }
  0x23   :  { %2499 = vmatpush3.msra.mxu0 %v3226_v32  ;;  %2527 = vmatprep.subr.mxu1 %v3780_v3 }
  0x24   :  { %2538 = vmatprep.subr.mxu0 %v3780_v3  ;;  %2501 = vmatmul.mubr.f32.vlgmr.msra.gmra.mxu0 %v118_v0  ;;  %v32_v0 = vld [vmem:[%s3755_s2] sm:$0xf]  ;;  %s2977_s2 = smov [#allocation2]  }
  0x25   :  { %2528 = vmatpush3.msra.mxu1 %v3298_v56  ;;  %2539 = vmatpush3.msra.mxu0 %v3042_v15  ;;  %s2232_s19 = sshll.u32 %s2977_s2, 4  ;;  %s2233_s19 = int_to_ptr.vmem [resolvable:$true] %s2232_s19 }
  0x26   :  { %2529 = vmatprep.subr.mxu1 %v3780_v3  ;;  %2540 = vmatprep.subr.mxu0 %v3780_v3  ;;  %s2953_s20 = scalar_lea.vmem %s2233_s19, 64  ;;  %p2958_p1 = scmp.lt.s32.totalorder %s2233_s19, %s2233_s19 }
  0x27   :  { %2530 = vmatpush3.msra.mxu1 %v3306_v1  ;;  %2541 = vmatpush3.msra.mxu0 %v3045_v16  ;;  %p2954_p0 = scmp.ne.s32.totalorder %s2233_s19, %s2953_s20  ;;  %p2959_p2 = scmp.lt.s32.totalorder %s2953_s20, %s2953_s20 }
  0x28   :  { %2531 = vmatprep.subr.mxu1 %v3780_v3  ;;  %2542 = vmatprep.subr.mxu0 %v3780_v3 }
  0x29   :  { %2532 = vmatpush3.msra.mxu1 %v3313_v14  ;;  %2543 = vmatpush3.msra.mxu0 %v3050_v18  ;;  %p2960_p3 = por %p2959_p2, %p2958_p1 }
  0x2a   :  { %2533 = vmatprep.subr.mxu1 %v3780_v3  ;;  %2544 = vmatprep.subr.mxu0 %v3780_v3 }
  0x2b   :  { %2534 = vmatpush3.msra.mxu1 %v3319_v33  ;;  %2545 = vmatpush3.msra.mxu0 %v3057_v20  ;;  %p2961_p4 = pnand %p2960_p3, %p2954_p0 }
  0x2c   :  { %2536 = vmatmul.mubr.f32.vlgmr.msra.gmra.mxu1 %v3183_v62  ;;  %2546 = vmatprep.subr.mxu0 %v3780_v3 }
  0x2d   :  { %2573 = vmatprep.subr.mxu1 %v3780_v3  ;;  %2547 = vmatpush3.msra.mxu0 %v3060_v21 }
  0x2e   :  { %2574 = vmatpush3.msra.mxu1 %v3008_v4  ;;  %2548 = vmatprep.subr.mxu0 %v3780_v3 }
  0x2f   :  { %2575 = vmatprep.subr.mxu1 %v3780_v3  ;;  %2549 = vmatpush3.msra.mxu0 %v3087_v30 }
  0x30   :  { %2576 = vmatpush3.msra.mxu1 %v3010_v5  ;;  %2550 = vmatprep.subr.mxu0 %v3780_v3 }
  0x31   :  { %2577 = vmatprep.subr.mxu1 %v3780_v3  ;;  %2551 = vmatpush3.msra.mxu0 %v3097_v34 }
  0x32   :  { %2578 = vmatpush3.msra.mxu1 %v3012_v6  ;;  %2552 = vmatprep.subr.mxu0 %v3780_v3 }
  0x33   :  { %2579 = vmatprep.subr.mxu1 %v3780_v3  ;;  %2553 = vmatpush3.msra.mxu0 %v3122_v43 }
  0x34   :  { %2580 = vmatpush3.msra.mxu1 %v3024_v10  ;;  %2554 = vmatprep.subr.mxu0 %v3780_v3 }
  0x35   :  { %2581 = vmatprep.subr.mxu1 %v3780_v3  ;;  %2555 = vmatpush3.msra.mxu0 %v3134_v47 }
  0x36   :  { %2582 = vmatpush3.msra.mxu1 %v3026_v11  ;;  %2556 = vmatprep.subr.mxu0 %v3780_v3 }
  0x37   :  { %2583 = vmatprep.subr.mxu1 %v3780_v3  ;;  %2557 = vmatpush3.msra.mxu0 %v3161_v55 }
  0x38   :  { %2584 = vmatpush3.msra.mxu1 %v3028_v12  ;;  %2558 = vmatprep.subr.mxu0 %v3780_v3 }
  0x39   :  { %2585 = vmatprep.subr.mxu1 %v3780_v3  ;;  %2559 = vmatpush3.msra.mxu0 %v3180_v61 }
  0x3a   :  { %2586 = vmatpush3.msra.mxu1 %v3047_v17  ;;  %2560 = vmatprep.subr.mxu0 %v3780_v3 }
  0x3b   :  { %2587 = vmatprep.subr.mxu1 %v3780_v3  ;;  %2561 = vmatpush3.msra.mxu0 %v3202_v8 }
  0x3c   :  { %2588 = vmatpush3.msra.mxu1 %v3072_v25  ;;  %2562 = vmatprep.subr.mxu0 %v3780_v3 }
  0x3d   :  { %2589 = vmatprep.subr.mxu1 %v3780_v3  ;;  %2563 = vmatpush3.msra.mxu0 %v3222_v31 }
  0x3e   :  { %2590 = vmatpush3.msra.mxu1 %v3081_v28  ;;  %2564 = vmatprep.subr.mxu0 %v3780_v3 }
  0x3f   :  { %2591 = vmatprep.subr.mxu1 %v3780_v3  ;;  %2565 = vmatpush3.msra.mxu0 %v3238_v41 }
  0x40   :  { %2592 = vmatpush3.msra.mxu1 %v3100_v35  ;;  %2566 = vmatprep.subr.mxu0 %v3780_v3 }
  0x41   :  { %2593 = vmatprep.subr.mxu1 %v3780_v3  ;;  %2567 = vmatpush3.msra.mxu0 %v3253_v54 }
  0x42   :  { %2594 = vmatpush3.msra.mxu1 %v3128_v45  ;;  %2568 = vmatprep.subr.mxu0 %v3780_v3 }
  0x43   :  { %2595 = vmatprep.subr.mxu1 %v3780_v3  ;;  %2569 = vmatpush3.msra.mxu0 %v3267_v50 }
  0x44   :  { %2570 = vmatprep.mubr.msk.f32.mxu0 %vm2976_vm0, %v3780_v3  ;;  %2596 = vmatpush3.msra.mxu1 %v3138_v48 }
  0x45   :  { %2571 = vmatmul.mubr.f32.vlgmr.msra.gmra.mxu0 %v3219_v26  ;;  %2597 = vmatprep.subr.mxu1 %v3780_v3  ;;  %v680_v26 = vsel %vm678_vm1, %v32_v0, 0 }
  0x46   :  { %2608 = vmatprep.subr.mxu0 %v3780_v3  ;;  %2598 = vmatpush3.msra.mxu1 %v3174_v59  ;;  %v3473_v42 = vand.u32 4294901760, %v680_v26 }
  0x47   :  { %2609 = vmatpush3.msra.mxu0 %v3064_v22  ;;  %2599 = vmatprep.subr.mxu1 %v3780_v3 }
  0x48   :  { %2610 = vmatprep.subr.mxu0 %v3780_v3  ;;  %2600 = vmatpush3.msra.mxu1 %v3187_v63  ;;  %v3476_v9 = vsub.f32 %v680_v26, %v3473_v42 }
  0x49   :  { %2611 = vmatpush3.msra.mxu0 %v3067_v23  ;;  %2601 = vmatprep.subr.mxu1 %v3780_v3 }
  0x4a   :  { %2612 = vmatprep.subr.mxu0 %v3780_v3  ;;  %2602 = vmatpush3.msra.mxu1 %v3208_v13 }
  0x4b   :  { %2613 = vmatpush3.msra.mxu0 %v3070_v24  ;;  %2603 = vmatprep.subr.mxu1 %v3780_v3 }
  0x4c   :  { %2614 = vmatprep.subr.mxu0 %v3780_v3  ;;  %2604 = vmatpush3.msra.mxu1 %v3226_v32 }
  0x4d   :  { %2605 = vmatprep.mubr.msk.f32.mxu1 %vm2976_vm0, %v3780_v3  ;;  %2615 = vmatpush3.msra.mxu0 %v3079_v27 }
  0x4e   :  { %2606 = vmatmul.mubr.f32.vlgmr.msra.gmra.mxu1 %v3807_v51  ;;  %2616 = vmatprep.subr.mxu0 %v3780_v3 }
  0x4f   :  { %2643 = vmatprep.subr.mxu1 %v3780_v3  ;;  %2617 = vmatpush3.msra.mxu0 %v3084_v29 }
  0x50   :  { %2644 = vmatpush3.msra.mxu1 %v3008_v4  ;;  %2618 = vmatprep.subr.mxu0 %v3780_v3 }
  0x51   :  { %2645 = vmatprep.subr.mxu1 %v3780_v3  ;;  %2619 = vmatpush3.msra.mxu0 %v3113_v40 }
  0x52   :  { %2646 = vmatpush3.msra.mxu1 %v3010_v5  ;;  %2620 = vmatprep.subr.mxu0 %v3780_v3 }
  0x53   :  { %2647 = vmatprep.subr.mxu1 %v3780_v3  ;;  %2621 = vmatpush3.msra.mxu0 %v3131_v46 }
  0x54   :  { %2648 = vmatpush3.msra.mxu1 %v3012_v6  ;;  %2622 = vmatprep.subr.mxu0 %v3780_v3 }
  0x55   :  { %2649 = vmatprep.subr.mxu1 %v3780_v3  ;;  %2623 = vmatpush3.msra.mxu0 %v3155_v53 }
  0x56   :  { %2650 = vmatpush3.msra.mxu1 %v3024_v10  ;;  %2624 = vmatprep.subr.mxu0 %v3780_v3 }
  0x57   :  { %2651 = vmatprep.subr.mxu1 %v3780_v3  ;;  %2625 = vmatpush3.msra.mxu0 %v3168_v57 }
  0x58   :  { %2652 = vmatpush3.msra.mxu1 %v3026_v11  ;;  %2626 = vmatprep.subr.mxu0 %v3780_v3 }
  0x59   :  { %2653 = vmatprep.subr.mxu1 %v3780_v3  ;;  %2627 = vmatpush3.msra.mxu0 %v3196_v2 }
  0x5a   :  { %2654 = vmatpush3.msra.mxu1 %v3028_v12  ;;  %2628 = vmatprep.subr.mxu0 %v3780_v3 }
  0x5b   :  { %2655 = vmatprep.subr.mxu1 %v3780_v3  ;;  %2629 = vmatpush3.msra.mxu0 %v3215_v19 }
  0x5c   :  { %2656 = vmatpush3.msra.mxu1 %v3047_v17  ;;  %2630 = vmatprep.subr.mxu0 %v3780_v3 }
  0x5d   :  { %2657 = vmatprep.subr.mxu1 %v3780_v3  ;;  %2631 = vmatpush3.msra.mxu0 %v3235_v39 }
  0x5e   :  { %2658 = vmatpush3.msra.mxu1 %v3072_v25  ;;  %2632 = vmatprep.subr.mxu0 %v3780_v3 }
  0x5f   :  { %2659 = vmatprep.subr.mxu1 %v3780_v3  ;;  %2633 = vmatpush3.msra.mxu0 %v3250_v58 }
  0x60   :  { %2660 = vmatpush3.msra.mxu1 %v3081_v28  ;;  %2634 = vmatprep.subr.mxu0 %v3780_v3 }
  0x61   :  { %2661 = vmatprep.subr.mxu1 %v3780_v3  ;;  %2635 = vmatpush3.msra.mxu0 %v3264_v52 }
  0x62   :  { %2662 = vmatpush3.msra.mxu1 %v3100_v35  ;;  %2636 = vmatprep.subr.mxu0 %v3780_v3 }
  0x63   :  { %2663 = vmatprep.subr.mxu1 %v3780_v3  ;;  %2637 = vmatpush3.msra.mxu0 %v3281_v7 }
  0x64   :  { %2664 = vmatpush3.msra.mxu1 %v3128_v45  ;;  %2638 = vmatprep.subr.mxu0 %v3780_v3 }
  0x65   :  { %2665 = vmatprep.subr.mxu1 %v3780_v3  ;;  %2639 = vmatpush3.msra.mxu0 %v3292_v36 }
  0x66   :  { %2640 = vmatprep.mubr.msk.f32.mxu0 %vm2976_vm0, %v3780_v3  ;;  %2666 = vmatpush3.msra.mxu1 %v3138_v48 }
  0x67   :  { %2641 = vmatmul.mubr.f32.vlgmr.msra.gmra.mxu0 %v3183_v62  ;;  %2667 = vmatprep.subr.mxu1 %v3780_v3 }
  0x68   :  { %2675 = vmatprep.mubr.msk.f32.mxu1 %vm2976_vm0, %v3780_v3  ;;  %2668 = vmatpush3.msra.mxu1 %v3174_v59 }
  0x69   :  { %2678 = vmatprep.subr.mxu0 %v3780_v3  ;;  %2669 = vmatprep.subr.mxu1 %v3780_v3 }
  0x6a   :  { %2680 = vmatprep.mubr.msk.f32.mxu0 %vm2976_vm0, %v3780_v3  ;;  %2670 = vmatpush3.msra.mxu1 %v3187_v63 }
  0x6b   :  { %2671 = vmatprep.subr.mxu1 %v3780_v3  ;;  %2679 = vmatpush3.msra.mxu0 %v3473_v42 }
  0x6c   :  { %2672 = vmatpush3.msra.mxu1 %v3208_v13  ;;  %2688 = vmatprep.subr.mxu0 %v3780_v3 }
  0x6d   :  { %2673 = vmatprep.subr.mxu1 %v3780_v3 }
  0x6e   :  { %2674 = vmatpush3.msra.mxu1 %v3226_v32 }
  0x6f   :  { %2676 = vmatmul.mubr.f32.vlgmr.msra.gmra.mxu1 %v3183_v62  ;;  %2683 = vmatprep.subr.mxu1 %v3780_v3  ;;  %v3481_v62 = vand.u32 4294901760, %v3476_v9 }
  0x70   :  { %2685 = vmatprep.mubr.msk.f32.mxu1 %vm2976_vm0, %v3780_v3 }
  0x71   :  { %v792_v51 = vsub.f32 %v3476_v9, %v3481_v62 }
  0x73   :  { %v3485_v36 = vand.u32 4294901760, %v792_v51 }
  0x75   :  { %3808 = vst [vmem:[#allocation28_spill] sm:$0xff] %v3485_v36  ;;  %2684 = vmatpush3.msra.mxu1 %v3485_v36 }
  0x76   :  { %2693 = vmatprep.subr.mxu1 %v3780_v3 }
  0xe4   :  { %v120_v0 = vpop.f32.mrf.mxu0 }
  0xe6   :  { %v2502_v7 = vpop.f32.mrf.mxu0 }
  0xec   :  { %v271_v26 = vpop.f32.mrf.mxu1 }
  0xed   :  { %v272_v53 = vadd.f32 %v271_v26, %v120_v0 }
  0xee   :  { %v2537_v52 = vpop.f32.mrf.mxu1 }
 0x105   :  { %v375_v58 = vpop.f32.mrf.mxu0 }
 0x106   :  { %v376_v40 = vadd.f32 %v375_v58, %v272_v53 }
 0x107   :  { %v2572_v39 = vpop.f32.mrf.mxu0 }
 0x108   :  { %v3809_v39 = vmov 0.0  }
 0x10e   :  { %v464_v19 = vpop.f32.mrf.mxu1 }
 0x10f   :  { %v465_v29 = vadd.f32 %v464_v19, %v376_v40 }
 0x110   :  { %v2607_v2 = vpop.f32.mrf.mxu1 }
 0x127   :  { %v583_v57 = vpop.f32.mrf.mxu0 }
 0x128   :  { %v584_v27 = vadd.f32 %v583_v57, %v465_v29  ;;  %v3812_v29 = vld [vmem:[#allocation16_spill] sm:$0xff] }
 0x129   :  { %v2642_v46 = vpop.f32.mrf.mxu0 }
 0x12f   :  { %v670_v51 = vpop.f32.mrf.mxu1 }
 0x130   :  { %v671_v24 = vadd.f32 %v670_v51, %v584_v27 }
 0x131   :  { %v2677_v36 = vpop.f32.mrf.mxu1 }
 0x132   :  { %v676_v3 = vsel %vm674_vm2, %v671_v24, 0  ;;  %v3811_v24 = vld [vmem:[#allocation14_spill] sm:$0xff] }
 0x133   :  { %v748_v23 = vand.u32 4294901760, %v676_v3 }
 0x135   :  { %v749_v7 = vsub.f32 %v676_v3, %v748_v23  ;;  %2686 = vmatmul.mubr.f32.vlgmr.msra.gmra.mxu1 %v748_v23  ;;  %v3810_v3 = vld [vmem:[#allocation12_spill] sm:$0xff] }
 0x136   :  { %2694 = vmatpush3.msra.mxu1 %v3473_v42  ;;  %2695 = vmatprep.mubr.msk.f32.mxu1 %vm2976_vm0, %v3809_v39 }
 0x137   :  { %v750_v2 = vand.u32 4294901760, %v749_v7  ;;  %2703 = vmatprep.subr.mxu1 %v3809_v39 }
 0x139   :  { %2696 = vmatmul.mubr.f32.vlgmr.msra.gmra.mxu1 %v750_v2  ;;  %v751_v40 = vsub.f32 %v749_v7, %v750_v2 }
 0x13a   :  { %2704 = vmatpush3.msra.mxu1 %v3473_v42  ;;  %2705 = vmatprep.mubr.msk.f32.mxu1 %vm2976_vm0, %v3809_v39 }
 0x13b   :  { %v752_v27 = vand.u32 4294901760, %v751_v40  ;;  %2743 = vmatprep.subr.mxu1 %v3809_v39  ;;  %v3817_v40 = vld [vmem:[#allocation11_spill] sm:$0xff] }
 0x13d   :  { %2681 = vmatmul.mubr.f32.vlgmr.msra.gmra.mxu0 %v752_v27  ;;  %2706 = vmatmul.mubr.f32.vlgmr.msra.gmra.mxu1 %v748_v23 }
 0x13e   :  { %2689 = vmatpush3.msra.mxu0 %v3476_v9  ;;  %2690 = vmatprep.mubr.msk.f32.mxu0 %vm2976_vm0, %v3809_v39 }
 0x13f   :  { %2698 = vmatprep.subr.mxu0 %v3809_v39  ;;  %2744 = vmatpush3.msra.mxu1 %v3106_v37  ;;  %v3814_v37 = vld [vmem:[#allocation20_spill] sm:$0xff] }
 0x140   :  { %2745 = vmatprep.subr.mxu1 %v3809_v39  ;;  %2775 = vmatprep.mubr.msk.f32.mxu1 %vm2976_vm0, %v3809_v39 }
 0x141   :  { %2691 = vmatmul.mubr.f32.vlgmr.msra.gmra.mxu0 %v749_v7  ;;  %2746 = vmatpush3.msra.mxu1 %v3108_v38  ;;  %v3815_v38 = vld [vmem:[#allocation22_spill] sm:$0xff] }
 0x142   :  { %2699 = vmatpush3.msra.mxu0 %v3481_v62  ;;  %2700 = vmatprep.mubr.msk.f32.mxu0 %vm2976_vm0, %v3809_v39 }
 0x143   :  { %2747 = vmatprep.subr.mxu1 %v3809_v39  ;;  %2708 = vmatprep.subr.mxu0 %v3809_v39 }
 0x144   :  { %2748 = vmatpush3.msra.mxu1 %v3126_v44  ;;  %v3816_v44 = vld [vmem:[#allocation24_spill] sm:$0xff] }
 0x145   :  { %2701 = vmatmul.mubr.f32.vlgmr.msra.gmra.mxu0 %v748_v23  ;;  %2749 = vmatprep.subr.mxu1 %v3809_v39  ;;  %v3813_v23 = vld [vmem:[#allocation18_spill] sm:$0xff] }
 0x146   :  { %2750 = vmatpush3.msra.mxu1 %v3810_v3  ;;  %2709 = vmatpush3.msra.mxu0 %v3008_v4 }
 0x147   :  { %2751 = vmatprep.subr.mxu1 %v3809_v39  ;;  %2710 = vmatprep.subr.mxu0 %v3809_v39 }
 0x148   :  { %2752 = vmatpush3.msra.mxu1 %v3811_v24  ;;  %2711 = vmatpush3.msra.mxu0 %v3010_v5 }
 0x149   :  { %2753 = vmatprep.subr.mxu1 %v3809_v39  ;;  %2712 = vmatprep.subr.mxu0 %v3809_v39 }
 0x14a   :  { %2754 = vmatpush3.msra.mxu1 %v3812_v29  ;;  %2713 = vmatpush3.msra.mxu0 %v3012_v6 }
 0x14b   :  { %2755 = vmatprep.subr.mxu1 %v3809_v39  ;;  %2714 = vmatprep.subr.mxu0 %v3809_v39 }
 0x14c   :  { %2756 = vmatpush3.msra.mxu1 %v3813_v23  ;;  %2715 = vmatpush3.msra.mxu0 %v3024_v10 }
 0x14d   :  { %2757 = vmatprep.subr.mxu1 %v3809_v39  ;;  %2716 = vmatprep.subr.mxu0 %v3809_v39 }
 0x14e   :  { %2758 = vmatpush3.msra.mxu1 %v3814_v37  ;;  %2717 = vmatpush3.msra.mxu0 %v3026_v11 }
 0x14f   :  { %2759 = vmatprep.subr.mxu1 %v3809_v39  ;;  %2718 = vmatprep.subr.mxu0 %v3809_v39 }
 0x150   :  { %2760 = vmatpush3.msra.mxu1 %v3815_v38  ;;  %2719 = vmatpush3.msra.mxu0 %v3028_v12 }
 0x151   :  { %2761 = vmatprep.subr.mxu1 %v3809_v39  ;;  %2720 = vmatprep.subr.mxu0 %v3809_v39 }
 0x152   :  { %2762 = vmatpush3.msra.mxu1 %v3816_v44  ;;  %2721 = vmatpush3.msra.mxu0 %v3047_v17 }
 0x153   :  { %2763 = vmatprep.subr.mxu1 %v3809_v39  ;;  %2722 = vmatprep.subr.mxu0 %v3809_v39 }
 0x154   :  { %2764 = vmatpush3.msra.mxu1 %v3273_v60  ;;  %2723 = vmatpush3.msra.mxu0 %v3072_v25 }
 0x155   :  { %2765 = vmatprep.subr.mxu1 %v3809_v39  ;;  %2724 = vmatprep.subr.mxu0 %v3809_v39 }
 0x156   :  { %2766 = vmatpush3.msra.mxu1 %v3287_v49  ;;  %2725 = vmatpush3.msra.mxu0 %v3081_v28 }
 0x157   :  { %2767 = vmatprep.subr.mxu1 %v3809_v39  ;;  %2726 = vmatprep.subr.mxu0 %v3809_v39 }
 0x158   :  { %2768 = vmatpush3.msra.mxu1 %v3298_v56  ;;  %2727 = vmatpush3.msra.mxu0 %v3100_v35 }
 0x159   :  { %2769 = vmatprep.subr.mxu1 %v3809_v39  ;;  %2728 = vmatprep.subr.mxu0 %v3809_v39 }
 0x15a   :  { %2770 = vmatpush3.msra.mxu1 %v3306_v1  ;;  %2729 = vmatpush3.msra.mxu0 %v3128_v45 }
 0x15b   :  { %2771 = vmatprep.subr.mxu1 %v3809_v39  ;;  %2730 = vmatprep.subr.mxu0 %v3809_v39 }
 0x15c   :  { %2772 = vmatpush3.msra.mxu1 %v3313_v14  ;;  %2731 = vmatpush3.msra.mxu0 %v3138_v48 }
 0x15d   :  { %2773 = vmatprep.subr.mxu1 %v3809_v39  ;;  %2732 = vmatprep.subr.mxu0 %v3809_v39 }
 0x15e   :  { %2774 = vmatpush3.msra.mxu1 %v3319_v33  ;;  %2733 = vmatpush3.msra.mxu0 %v3174_v59 }
 0x15f   :  { %2813 = vmatprep.subr.mxu1 %v3809_v39  ;;  %2734 = vmatprep.subr.mxu0 %v3809_v39 }
 0x160   :  { %2735 = vmatpush3.msra.mxu0 %v3187_v63  ;;  %2740 = vmatprep.mubr.msk.f32.mxu0 %vm2976_vm0, %v3809_v39 }
 0x161   :  { %2736 = vmatprep.subr.mxu0 %v3809_v39 }
 0x162   :  { %2737 = vmatpush3.msra.mxu0 %v3208_v13 }
 0x163   :  { %2738 = vmatprep.subr.mxu0 %v3809_v39 }
 0x164   :  { %2739 = vmatpush3.msra.mxu0 %v3226_v32 }
 0x165   :  { %2778 = vmatprep.subr.mxu0 %v3809_v39 }
 0x1f5   :  { %v830_v46 = vpop.f32.mrf.mxu1 }
 0x1f7   :  { %v2687_v53 = vpop.f32.mrf.mxu1 }
 0x1f9   :  { %v978_v56 = vpop.f32.mrf.mxu1 }
 0x1fb   :  { %v2697_v57 = vpop.f32.mrf.mxu1 }
 0x1fd   :  { %v754_v19 = vpop.f32.mrf.mxu0  ;;  %v1124_v52 = vpop.f32.mrf.mxu1 }
 0x1fe   :  { %v831_v60 = vadd.f32 %v830_v46, %v754_v19 }
 0x1ff   :  { %v2682_v58 = vpop.f32.mrf.mxu0  ;;  %v2707_v1 = vpop.f32.mrf.mxu1 }
 0x201   :  { %v904_v49 = vpop.f32.mrf.mxu0 }
 0x202   :  { %v905_v36 = vadd.f32 %v904_v49, %v831_v60 }
 0x203   :  { %v2692_v14 = vpop.f32.mrf.mxu0 }
 0x204   :  { %v979_v33 = vadd.f32 %v978_v56, %v905_v36 }
 0x205   :  { %v1052_v0 = vpop.f32.mrf.mxu0 }
 0x206   :  { %v1053_v26 = vadd.f32 %v1052_v0, %v979_v33 }
 0x207   :  { %v2702_v51 = vpop.f32.mrf.mxu0 }
 0x208   :  { %v1125_v7 = vadd.f32 %v1124_v52, %v1053_v26 }
 0x20a   :  { %v1128_v2 = vmul.f32 0.03125, %v1125_v7 }
 0x20c   :  { %v3575_v27 = vsub.f32 %v3817_v40, %v1128_v2 }
 0x20e   :  { %v1130_v3 = vmul.f32 %v3575_v27, %v3575_v27 }
 0x210   :  { %v3579_v24 = vand.u32 4294901760, %v1130_v3 }
 0x212   :  { %2776 = vmatmul.mubr.f32.vlgmr.msra.gmra.mxu1 %v3579_v24  ;;  %v3583_v29 = vsub.f32 %v1130_v3, %v3579_v24 }
 0x213   :  { %2814 = vmatpush3.msra.mxu1 %v3008_v4  ;;  %2845 = vmatprep.mubr.msk.f32.mxu1 %vm2976_vm0, %v3809_v39 }
 0x214   :  { %2815 = vmatprep.subr.mxu1 %v3809_v39  ;;  %v1214_v23 = vand.u32 4294901760, %v3583_v29 }
 0x215   :  { %2816 = vmatpush3.msra.mxu1 %v3010_v5 }
 0x216   :  { %2817 = vmatprep.subr.mxu1 %v3809_v39  ;;  %v1215_v37 = vsub.f32 %v3583_v29, %v1214_v23 }
 0x217   :  { %2818 = vmatpush3.msra.mxu1 %v3012_v6 }
 0x218   :  { %2819 = vmatprep.subr.mxu1 %v3809_v39  ;;  %v1216_v38 = vand.u32 4294901760, %v1215_v37 }
 0x219   :  { %2820 = vmatpush3.msra.mxu1 %v3024_v10 }
 0x21a   :  { %2821 = vmatprep.subr.mxu1 %v3809_v39  ;;  %2741 = vmatmul.mubr.f32.vlgmr.msra.gmra.mxu0 %v1216_v38 }
 0x21b   :  { %2779 = vmatpush3.msra.mxu0 %v3042_v15  ;;  %2822 = vmatpush3.msra.mxu1 %v3026_v11  ;;  %v3824_v15 = vld [vmem:[#allocation13_spill] sm:$0xff] }
 0x21c   :  { %2780 = vmatprep.subr.mxu0 %v3809_v39  ;;  %2823 = vmatprep.subr.mxu1 %v3809_v39 }
 0x21d   :  { %2781 = vmatpush3.msra.mxu0 %v3045_v16  ;;  %2824 = vmatpush3.msra.mxu1 %v3028_v12  ;;  %v3825_v16 = vld [vmem:[#allocation15_spill] sm:$0xff] }
 0x21e   :  { %2782 = vmatprep.subr.mxu0 %v3809_v39  ;;  %2825 = vmatprep.subr.mxu1 %v3809_v39 }
 0x21f   :  { %2783 = vmatpush3.msra.mxu0 %v3050_v18  ;;  %2826 = vmatpush3.msra.mxu1 %v3047_v17  ;;  %v3827_v18 = vld [vmem:[#allocation19_spill] sm:$0xff] }
 0x220   :  { %2784 = vmatprep.subr.mxu0 %v3809_v39  ;;  %2827 = vmatprep.subr.mxu1 %v3809_v39 }
 0x221   :  { %2785 = vmatpush3.msra.mxu0 %v3057_v20  ;;  %2828 = vmatpush3.msra.mxu1 %v3072_v25  ;;  %v3828_v20 = vld [vmem:[#allocation21_spill] sm:$0xff] }
 0x222   :  { %2786 = vmatprep.subr.mxu0 %v3809_v39  ;;  %2829 = vmatprep.subr.mxu1 %v3809_v39 }
 0x223   :  { %2787 = vmatpush3.msra.mxu0 %v3060_v21  ;;  %2830 = vmatpush3.msra.mxu1 %v3081_v28  ;;  %v3829_v21 = vld [vmem:[#allocation23_spill] sm:$0xff] }
 0x224   :  { %2788 = vmatprep.subr.mxu0 %v3809_v39  ;;  %2831 = vmatprep.subr.mxu1 %v3809_v39 }
 0x225   :  { %2789 = vmatpush3.msra.mxu0 %v3087_v30  ;;  %2832 = vmatpush3.msra.mxu1 %v3100_v35  ;;  %v3833_v30 = vld [vmem:[#allocation27_spill] sm:$0xff] }
 0x226   :  { %2790 = vmatprep.subr.mxu0 %v3809_v39  ;;  %2833 = vmatprep.subr.mxu1 %v3809_v39 }
 0x227   :  { %2791 = vmatpush3.msra.mxu0 %v3097_v34  ;;  %2834 = vmatpush3.msra.mxu1 %v3128_v45 }
 0x228   :  { %2792 = vmatprep.subr.mxu0 %v3809_v39  ;;  %2835 = vmatprep.subr.mxu1 %v3809_v39 }
 0x229   :  { %2793 = vmatpush3.msra.mxu0 %v3122_v43  ;;  %2836 = vmatpush3.msra.mxu1 %v3138_v48 }
 0x22a   :  { %2794 = vmatprep.subr.mxu0 %v3809_v39  ;;  %2837 = vmatprep.subr.mxu1 %v3809_v39 }
 0x22b   :  { %2795 = vmatpush3.msra.mxu0 %v3134_v47  ;;  %2838 = vmatpush3.msra.mxu1 %v3174_v59 }
 0x22c   :  { %2796 = vmatprep.subr.mxu0 %v3809_v39  ;;  %2839 = vmatprep.subr.mxu1 %v3809_v39 }
 0x22d   :  { %2797 = vmatpush3.msra.mxu0 %v3161_v55  ;;  %2840 = vmatpush3.msra.mxu1 %v3187_v63 }
 0x22e   :  { %2798 = vmatprep.subr.mxu0 %v3809_v39  ;;  %2841 = vmatprep.subr.mxu1 %v3809_v39 }
 0x22f   :  { %2799 = vmatpush3.msra.mxu0 %v3180_v61  ;;  %2842 = vmatpush3.msra.mxu1 %v3208_v13 }
 0x230   :  { %2800 = vmatprep.subr.mxu0 %v3809_v39  ;;  %2843 = vmatprep.subr.mxu1 %v3809_v39 }
 0x231   :  { %2801 = vmatpush3.msra.mxu0 %v3202_v8  ;;  %2844 = vmatpush3.msra.mxu1 %v3226_v32 }
 0x232   :  { %2802 = vmatprep.subr.mxu0 %v3809_v39  ;;  %2846 = vmatmul.mubr.f32.vlgmr.msra.gmra.mxu1 %v1214_v23 }
 0x233   :  { %2883 = vmatprep.subr.mxu1 %v3809_v39  ;;  %2803 = vmatpush3.msra.mxu0 %v3222_v31 }
 0x234   :  { %2884 = vmatpush3.msra.mxu1 %v3008_v4  ;;  %2804 = vmatprep.subr.mxu0 %v3809_v39  ;;  %v3818_v4 = vld [vmem:[#allocation5_spill] sm:$0xff] }
 0x235   :  { %2885 = vmatprep.subr.mxu1 %v3809_v39  ;;  %2805 = vmatpush3.msra.mxu0 %v3238_v41 }
 0x236   :  { %2886 = vmatpush3.msra.mxu1 %v3010_v5  ;;  %2806 = vmatprep.subr.mxu0 %v3809_v39  ;;  %v3819_v5 = vld [vmem:[#allocation6_spill] sm:$0xff] }
 0x237   :  { %2887 = vmatprep.subr.mxu1 %v3809_v39  ;;  %2807 = vmatpush3.msra.mxu0 %v3253_v54 }
 0x238   :  { %2888 = vmatpush3.msra.mxu1 %v3012_v6  ;;  %2808 = vmatprep.subr.mxu0 %v3809_v39  ;;  %v3820_v6 = vld [vmem:[#allocation7_spill] sm:$0xff] }
 0x239   :  { %2889 = vmatprep.subr.mxu1 %v3809_v39  ;;  %2809 = vmatpush3.msra.mxu0 %v3267_v50 }
 0x23a   :  { %2810 = vmatprep.mubr.msk.f32.mxu0 %vm2976_vm0, %v3809_v39  ;;  %2890 = vmatpush3.msra.mxu1 %v3024_v10  ;;  %v3821_v10 = vld [vmem:[#allocation8_spill] sm:$0xff] }
 0x23b   :  { %2811 = vmatmul.mubr.f32.vlgmr.msra.gmra.mxu0 %v3583_v29  ;;  %2848 = vmatprep.subr.mxu0 %v3809_v39 }
 0x23c   :  { %2891 = vmatprep.subr.mxu1 %v3809_v39  ;;  %2849 = vmatpush3.msra.mxu0 %v3064_v22  ;;  %v3830_v22 = vld [vmem:[#allocation25_spill] sm:$0xff] }
 0x23d   :  { %2892 = vmatpush3.msra.mxu1 %v3026_v11  ;;  %2850 = vmatprep.subr.mxu0 %v3809_v39  ;;  %v3822_v11 = vld [vmem:[#allocation9_spill] sm:$0xff] }
 0x23e   :  { %2893 = vmatprep.subr.mxu1 %v3809_v39  ;;  %2851 = vmatpush3.msra.mxu0 %v3818_v4 }
 0x23f   :  { %2894 = vmatpush3.msra.mxu1 %v3028_v12  ;;  %2852 = vmatprep.subr.mxu0 %v3809_v39  ;;  %v3823_v12 = vld [vmem:[#allocation10_spill] sm:$0xff] }
 0x240   :  { %2895 = vmatprep.subr.mxu1 %v3809_v39  ;;  %2853 = vmatpush3.msra.mxu0 %v3819_v5 }
 0x241   :  { %2896 = vmatpush3.msra.mxu1 %v3047_v17  ;;  %2854 = vmatprep.subr.mxu0 %v3809_v39  ;;  %v3826_v17 = vld [vmem:[#allocation17_spill] sm:$0xff] }
 0x242   :  { %2897 = vmatprep.subr.mxu1 %v3809_v39  ;;  %2855 = vmatpush3.msra.mxu0 %v3820_v6 }
 0x243   :  { %2898 = vmatpush3.msra.mxu1 %v3072_v25  ;;  %2856 = vmatprep.subr.mxu0 %v3809_v39  ;;  %v3831_v25 = vld [vmem:[#allocation28_spill] sm:$0xff] }
 0x244   :  { %2899 = vmatprep.subr.mxu1 %v3809_v39  ;;  %2857 = vmatpush3.msra.mxu0 %v3821_v10 }
 0x245   :  { %2900 = vmatpush3.msra.mxu1 %v3081_v28  ;;  %2858 = vmatprep.subr.mxu0 %v3809_v39  ;;  %v3832_v28 = vld [vmem:[#allocation26_spill] sm:$0xff] }
 0x246   :  { %2901 = vmatprep.subr.mxu1 %v3809_v39  ;;  %2859 = vmatpush3.msra.mxu0 %v3822_v11 }
 0x247   :  { %2902 = vmatpush3.msra.mxu1 %v3100_v35  ;;  %2860 = vmatprep.subr.mxu0 %v3809_v39 }
 0x248   :  { %2903 = vmatprep.subr.mxu1 %v3809_v39  ;;  %2861 = vmatpush3.msra.mxu0 %v3823_v12 }
 0x249   :  { %2904 = vmatpush3.msra.mxu1 %v3128_v45  ;;  %2862 = vmatprep.subr.mxu0 %v3809_v39 }
 0x24a   :  { %2905 = vmatprep.subr.mxu1 %v3809_v39  ;;  %2863 = vmatpush3.msra.mxu0 %v3824_v15 }
 0x24b   :  { %2906 = vmatpush3.msra.mxu1 %v3138_v48  ;;  %2864 = vmatprep.subr.mxu0 %v3809_v39 }
 0x24c   :  { %2907 = vmatprep.subr.mxu1 %v3809_v39  ;;  %2865 = vmatpush3.msra.mxu0 %v3825_v16 }
 0x24d   :  { %2908 = vmatpush3.msra.mxu1 %v3174_v59  ;;  %2866 = vmatprep.subr.mxu0 %v3809_v39 }
 0x24e   :  { %2909 = vmatprep.subr.mxu1 %v3809_v39  ;;  %2867 = vmatpush3.msra.mxu0 %v3826_v17 }
 0x24f   :  { %2910 = vmatpush3.msra.mxu1 %v3187_v63  ;;  %2868 = vmatprep.subr.mxu0 %v3809_v39 }
 0x250   :  { %2911 = vmatprep.subr.mxu1 %v3809_v39  ;;  %2869 = vmatpush3.msra.mxu0 %v3827_v18 }
 0x251   :  { %2912 = vmatpush3.msra.mxu1 %v3208_v13  ;;  %2870 = vmatprep.subr.mxu0 %v3809_v39 }
 0x252   :  { %2913 = vmatprep.subr.mxu1 %v3809_v39  ;;  %2871 = vmatpush3.msra.mxu0 %v3828_v20 }
 0x253   :  { %2914 = vmatpush3.msra.mxu1 %v3226_v32  ;;  %2915 = vmatprep.mubr.msk.f32.mxu1 %vm2976_vm0, %v3809_v39 }
 0x254   :  { %2872 = vmatprep.subr.mxu0 %v3809_v39  ;;  %2916 = vmatmul.mubr.f32.vlgmr.msra.gmra.mxu1 %v3579_v24 }
 0x255   :  { %2873 = vmatpush3.msra.mxu0 %v3829_v21  ;;  %2880 = vmatprep.mubr.msk.f32.mxu0 %vm2976_vm0, %v3809_v39 }
 0x256   :  { %2874 = vmatprep.subr.mxu0 %v3809_v39  ;;  %2923 = vmatprep.subr.mxu1 %v3809_v39 }
 0x257   :  { %2875 = vmatpush3.msra.mxu0 %v3830_v22  ;;  %2924 = vmatpush3.msra.mxu1 %v3831_v25 }
 0x258   :  { %2876 = vmatprep.subr.mxu0 %v3809_v39  ;;  %2925 = vmatprep.mubr.msk.f32.mxu1 %vm2976_vm0, %v3809_v39 }
 0x259   :  { %2877 = vmatpush3.msra.mxu0 %v3832_v28  ;;  %2933 = vmatprep.subr.mxu1 %v3809_v39 }
 0x25a   :  { %2878 = vmatprep.subr.mxu0 %v3809_v39 }
 0x25b   :  { %2879 = vmatpush3.msra.mxu0 %v3833_v30 }
 0x25c   :  { %2881 = vmatmul.mubr.f32.vlgmr.msra.gmra.mxu0 %v3579_v24  ;;  %2918 = vmatprep.subr.mxu0 %v3809_v39 }
 0x25d   :  { %2919 = vmatpush3.msra.mxu0 %v3473_v42  ;;  %2920 = vmatprep.mubr.msk.f32.mxu0 %vm2976_vm0, %v3809_v39 }
 0x25e   :  { %2928 = vmatprep.subr.mxu0 %v3809_v39 }
 0x2d2   :  { %v1369_v34 = vpop.f32.mrf.mxu1 }
 0x2d4   :  { %v2777_v35 = vpop.f32.mrf.mxu1 }
 0x2da   :  { %v1218_v43 = vpop.f32.mrf.mxu0 }
 0x2db   :  { %v1370_v61 = vadd.f32 %v1369_v34, %v1218_v43 }
 0x2dc   :  { %v2742_v45 = vpop.f32.mrf.mxu0 }
 0x2f2   :  { %v1562_v47 = vpop.f32.mrf.mxu1 }
 0x2f4   :  { %v2847_v48 = vpop.f32.mrf.mxu1 }
 0x2fb   :  { %v1473_v50 = vpop.f32.mrf.mxu0 }
 0x2fc   :  { %v1474_v8 = vadd.f32 %v1473_v50, %v1370_v61 }
 0x2fd   :  { %v2812_v55 = vpop.f32.mrf.mxu0 }
 0x2fe   :  { %v1563_v13 = vadd.f32 %v1562_v47, %v1474_v8 }
 0x314   :  { %v1768_v59 = vpop.f32.mrf.mxu1 }
 0x316   :  { %v2917_v63 = vpop.f32.mrf.mxu1 }
 0x31c   :  { %v1681_v31 = vpop.f32.mrf.mxu0 }
 0x31d   :  { %v1682_v32 = vadd.f32 %v1681_v31, %v1563_v13 }
 0x31e   :  { %v2882_v41 = vpop.f32.mrf.mxu0 }
 0x31f   :  { %v1769_v54 = vadd.f32 %v1768_v59, %v1682_v32 }
 0x321   :  { %v1773_v44 = vsel %vm674_vm2, %v1769_v54, 0 }
 0x322   :  { %v1841_v46 = vand.u32 4294901760, %v1773_v44 }
 0x324   :  { %v1842_v53 = vsub.f32 %v1773_v44, %v1841_v46  ;;  %2926 = vmatmul.mubr.f32.vlgmr.msra.gmra.mxu1 %v1841_v46 }
 0x325   :  { %2934 = vmatpush3.msra.mxu1 %v3473_v42  ;;  %2935 = vmatprep.mubr.msk.f32.mxu1 %vm2976_vm0, %v3809_v39 }
 0x326   :  { %v1843_v56 = vand.u32 4294901760, %v1842_v53  ;;  %2943 = vmatprep.subr.mxu1 %v3809_v39 }
 0x328   :  { %2936 = vmatmul.mubr.f32.vlgmr.msra.gmra.mxu1 %v1843_v56  ;;  %v1844_v57 = vsub.f32 %v1842_v53, %v1843_v56 }
 0x329   :  { %2944 = vmatpush3.msra.mxu1 %v3473_v42  ;;  %2945 = vmatprep.mubr.msk.f32.mxu1 %vm2976_vm0, %v3809_v39 }
 0x32a   :  { %v1845_v19 = vand.u32 4294901760, %v1844_v57 }
 0x32c   :  { %2921 = vmatmul.mubr.f32.vlgmr.msra.gmra.mxu0 %v1845_v19  ;;  %2946 = vmatmul.mubr.f32.vlgmr.msra.gmra.mxu1 %v1841_v46 }
 0x32d   :  { %2929 = vmatpush3.msra.mxu0 %v3476_v9  ;;  %2930 = vmatprep.mubr.msk.f32.mxu0 %vm2976_vm0, %v3809_v39 }
 0x32e   :  { %2938 = vmatprep.subr.mxu0 %v3809_v39 }
 0x330   :  { %2931 = vmatmul.mubr.f32.vlgmr.msra.gmra.mxu0 %v1842_v53 }
 0x331   :  { %2939 = vmatpush3.msra.mxu0 %v3481_v62  ;;  %2940 = vmatprep.mubr.msk.f32.mxu0 %vm2976_vm0, %v3809_v39 }
 0x334   :  { %2941 = vmatmul.mubr.f32.vlgmr.msra.gmra.mxu0 %v1841_v46 }
 0x3e4   :  { %v1923_v42 = vpop.f32.mrf.mxu1 }
 0x3e6   :  { %v2927_v52 = vpop.f32.mrf.mxu1 }
 0x3e8   :  { %v2071_v58 = vpop.f32.mrf.mxu1 }
 0x3ea   :  { %v2937_v1 = vpop.f32.mrf.mxu1 }
 0x3ec   :  { %v1847_v60 = vpop.f32.mrf.mxu0  ;;  %v2217_v49 = vpop.f32.mrf.mxu1 }
 0x3ed   :  { %v1924_v14 = vadd.f32 %v1923_v42, %v1847_v60 }
 0x3ee   :  { %v2922_v36 = vpop.f32.mrf.mxu0  ;;  %v2947_v9 = vpop.f32.mrf.mxu1 }
 0x3f0   :  { %v1997_v33 = vpop.f32.mrf.mxu0 }
 0x3f1   :  { %v1998_v0 = vadd.f32 %v1997_v33, %v1924_v14 }
 0x3f2   :  { %v2932_v26 = vpop.f32.mrf.mxu0 }
 0x3f3   :  { %v2072_v51 = vadd.f32 %v2071_v58, %v1998_v0 }
 0x3f4   :  { %v2145_v7 = vpop.f32.mrf.mxu0 }
 0x3f5   :  { %v2146_v2 = vadd.f32 %v2145_v7, %v2072_v51 }
 0x3f6   :  { %v2942_v62 = vpop.f32.mrf.mxu0 }
 0x3f7   :  { %v2218_v40 = vadd.f32 %v2217_v49, %v2146_v2 }
 0x3f9   :  { %v2221_v3 = vmul.f32 0.03125, %v2218_v40 }
 0x3fb   :  { %v2222_v39 = vadd.f32 1e-05, %v2221_v3 }
 0x3fd   :  { %2951 = vrsqrt.f32 %v2222_v39 }
 0x40a   :  { %v2952_v24 = vpop.eup %2951 }
 0x40b   :  { %v2224_v29 = vmul.f32 %v2952_v24, %v3575_v27 }
 0x40d   :  { %2225 = vst [vmem:[#allocation2] sm:$0xf] %v2224_v29 }
 0x40e   :  { %2964 = shalt.err (!%p2961_p4)
}
 0x40f   :  { %2235 = dma.vmem_to_hbm [thread:$0]  %s2233_s19, 64, %s3756_s3, [#allocation3]  }
 0x410   :  { %2973 = dma.done.wait [#allocation3], 64  }
 0x411   :  { %2974 = vsyncadd [#allocation3], 4294967232 }
 0x412   :  { %2239 = vsyncpa [#allocation3], 1 }

// kernel: tpu_custom_call.1
= control target key start
LH: loop header
LB: loop body
LE: loop exit
PB: predicated region body
PF: predicated region fallthrough
CT: control target
= control target key end

     0   :  { %v495_v1 = vmov 0.0   ;;  %vm496_vm0 = vmmov 0   ;;  %s627_s0 = inlined_call_operand.vmem [shape: f32[4,128], index: 0, kind: input, shape index: {}]   ;;  %s628_s1 = inlined_call_operand.vmem [shape: f32[128,4], index: 1, kind: input, shape index: {}]   ;;  %s629_s2 = inlined_call_operand.vmem [shape: f32[4,128], index: 2, kind: input, shape index: {}]   ;;  %s630_s3 = inlined_call_operand.hbm [shape: f32[4,128], index: 3, kind: output, shape index: {}]  }
   0x1   :  { %v521_v0 = vld [vmem:[%s628_s1 + $0x78] sm:$0xff]  ;;  %388 = vmatprep.subr.mxu0 %v495_v1  ;;  %v527_v2 = vld [vmem:[%s628_s1 + $0x70] sm:$0xff]  ;;  %420 = vmatprep.mubr.msk.f32.mxu0 %vm496_vm0, %v495_v1  ;;  %v29_v3 = vld [vmem:[%s628_s1 + $0x68] sm:$0xff] }
   0x2   :  { %389 = vmatpush3.msra.mxu0 %v521_v0  ;;  %423 = vmatprep.subr.mxu1 %v495_v1  ;;  %v28_v4 = vld [vmem:[%s628_s1 + $0x60] sm:$0xff] }
   0x3   :  { %390 = vmatprep.subr.mxu0 %v495_v1  ;;  %425 = vmatprep.mubr.msk.f32.mxu1 %vm496_vm0, %v495_v1 }
   0x4   :  { %391 = vmatpush3.msra.mxu0 %v527_v2 }
   0x5   :  { %392 = vmatprep.subr.mxu0 %v495_v1 }
   0x6   :  { %8 = vsyncpa [#allocation3], 0  ;;  %393 = vmatpush3.msra.mxu0 %v29_v3  ;;  %v27_v5 = vld [vmem:[%s628_s1 + $0x58] sm:$0xff]  ;;  %v26_v6 = vld [vmem:[%s628_s1 + $0x50] sm:$0xff]  ;;  %vm107_vm1 = vcmask 1043456   ;;  %vm103_vm2 = vcmask 31744  }
   0x7   :  { %394 = vmatprep.subr.mxu0 %v495_v1  ;;  %v25_v7 = vld [vmem:[%s628_s1 + $0x48] sm:$0xff]  ;;  %v24_v8 = vld [vmem:[%s628_s1 + $0x40] sm:$0xff]  ;;  %v23_v9 = vld [vmem:[%s628_s1 + $0x38] sm:$0xff] }
   0x8   :  { %395 = vmatpush3.msra.mxu0 %v28_v4  ;;  %v22_v10 = vld [vmem:[%s628_s1 + $0x30] sm:$0xff]  ;;  %v21_v11 = vld [vmem:[%s628_s1 + $0x28] sm:$0xff]  ;;  %v20_v12 = vld [vmem:[%s628_s1 + $0x20] sm:$0xff] }
   0x9   :  { %396 = vmatprep.subr.mxu0 %v495_v1  ;;  %v19_v13 = vld [vmem:[%s628_s1 + $0x18] sm:$0xff]  ;;  %v18_v14 = vld [vmem:[%s628_s1 + $0x10] sm:$0xff]  ;;  %v17_v15 = vld [vmem:[%s628_s1 + $0x8] sm:$0xff] }
   0xa   :  { %397 = vmatpush3.msra.mxu0 %v27_v5  ;;  %v16_v16 = vld [vmem:[%s628_s1] sm:$0xff] }
   0xb   :  { %398 = vmatprep.subr.mxu0 %v495_v1  ;;  %v15_v17 = vld [vmem:[%s627_s0] sm:$0xf]  ;;  %s497_s0 = smov [#allocation2]  }
   0xc   :  { %399 = vmatpush3.msra.mxu0 %v26_v6  ;;  %v32_v18 = vld [vmem:[%s629_s2] sm:$0xf]  ;;  %s338_s1 = sshll.u32 %s497_s0, 4  ;;  %s339_s1 = int_to_ptr.vmem [resolvable:$true] %s338_s1 }
   0xd   :  { %400 = vmatprep.subr.mxu0 %v495_v1  ;;  %424 = vmatpush3.msk.msra.mxu1 %vm107_vm1, %v32_v18  ;;  %s473_s2 = scalar_lea.vmem %s339_s1, 64  ;;  %p478_p1 = scmp.lt.s32.totalorder %s339_s1, %s339_s1 }
   0xe   :  { %401 = vmatpush3.msra.mxu0 %v25_v7  ;;  %428 = vmatprep.subr.mxu1 %v495_v1  ;;  %p474_p0 = scmp.ne.s32.totalorder %s339_s1, %s473_s2  ;;  %p479_p2 = scmp.lt.s32.totalorder %s473_s2, %s473_s2 }
   0xf   :  { %402 = vmatprep.subr.mxu0 %v495_v1 }
  0x10   :  { %403 = vmatpush3.msra.mxu0 %v24_v8  ;;  %p480_p3 = por %p479_p2, %p478_p1 }
  0x11   :  { %404 = vmatprep.subr.mxu0 %v495_v1 }
  0x12   :  { %405 = vmatpush3.msra.mxu0 %v23_v9  ;;  %p481_p4 = pnand %p480_p3, %p474_p0 }
  0x13   :  { %406 = vmatprep.subr.mxu0 %v495_v1 }
  0x14   :  { %407 = vmatpush3.msra.mxu0 %v22_v10 }
  0x15   :  { %408 = vmatprep.subr.mxu0 %v495_v1 }
  0x16   :  { %409 = vmatpush3.msra.mxu0 %v21_v11 }
  0x17   :  { %410 = vmatprep.subr.mxu0 %v495_v1 }
  0x18   :  { %411 = vmatpush3.msra.mxu0 %v20_v12 }
  0x19   :  { %412 = vmatprep.subr.mxu0 %v495_v1 }
  0x1a   :  { %413 = vmatpush3.msra.mxu0 %v19_v13 }
  0x1b   :  { %414 = vmatprep.subr.mxu0 %v495_v1 }
  0x1c   :  { %415 = vmatpush3.msra.mxu0 %v18_v14 }
  0x1d   :  { %416 = vmatprep.subr.mxu0 %v495_v1 }
  0x1e   :  { %417 = vmatpush3.msra.mxu0 %v17_v15 }
  0x1f   :  { %418 = vmatprep.subr.mxu0 %v495_v1 }
  0x20   :  { %419 = vmatpush3.msra.mxu0 %v16_v16 }
  0x21   :  { %421 = vmatmul.mubr.f32.vlgmr.msra.gmra.mxu0 %v15_v17  ;;  %463 = vmatprep.subr.mxu0 %v495_v1 }
  0x22   :  { %465 = vmatprep.mubr.msk.f32.mxu0 %vm496_vm0, %v495_v1  ;;  %464 = vmatpush3.msk.msra.mxu0 %vm107_vm1, %v32_v18 }
  0xe1   :  { %v99_v19 = vpop.f32.mrf.mxu0 }
  0xe2   :  { %426 = vmatmul.mubr.msk.f32.vlgmr.msra.gmra.mxu1 %vm103_vm2, %v99_v19 }
  0xe3   :  { %v422_v20 = vpop.f32.mrf.mxu0  ;;  %429 = vmatpush3.msra.mxu1 %v521_v0  ;;  %460 = vmatprep.mubr.msk.f32.mxu1 %vm496_vm0, %v495_v1 }
  0xe4   :  { %430 = vmatprep.subr.mxu1 %v495_v1 }
  0xe5   :  { %431 = vmatpush3.msra.mxu1 %v527_v2 }
  0xe6   :  { %432 = vmatprep.subr.mxu1 %v495_v1 }
  0xe7   :  { %433 = vmatpush3.msra.mxu1 %v29_v3 }
  0xe8   :  { %434 = vmatprep.subr.mxu1 %v495_v1 }
  0xe9   :  { %435 = vmatpush3.msra.mxu1 %v28_v4 }
  0xea   :  { %436 = vmatprep.subr.mxu1 %v495_v1 }
  0xeb   :  { %437 = vmatpush3.msra.mxu1 %v27_v5 }
  0xec   :  { %438 = vmatprep.subr.mxu1 %v495_v1 }
  0xed   :  { %439 = vmatpush3.msra.mxu1 %v26_v6 }
  0xee   :  { %440 = vmatprep.subr.mxu1 %v495_v1 }
  0xef   :  { %441 = vmatpush3.msra.mxu1 %v25_v7 }
  0xf0   :  { %442 = vmatprep.subr.mxu1 %v495_v1 }
  0xf1   :  { %443 = vmatpush3.msra.mxu1 %v24_v8 }
  0xf2   :  { %444 = vmatprep.subr.mxu1 %v495_v1 }
  0xf3   :  { %445 = vmatpush3.msra.mxu1 %v23_v9 }
  0xf4   :  { %446 = vmatprep.subr.mxu1 %v495_v1 }
  0xf5   :  { %447 = vmatpush3.msra.mxu1 %v22_v10 }
  0xf6   :  { %448 = vmatprep.subr.mxu1 %v495_v1 }
  0xf7   :  { %449 = vmatpush3.msra.mxu1 %v21_v11 }
  0xf8   :  { %450 = vmatprep.subr.mxu1 %v495_v1 }
  0xf9   :  { %451 = vmatpush3.msra.mxu1 %v20_v12 }
  0xfa   :  { %452 = vmatprep.subr.mxu1 %v495_v1 }
  0xfb   :  { %453 = vmatpush3.msra.mxu1 %v19_v13 }
  0xfc   :  { %454 = vmatprep.subr.mxu1 %v495_v1 }
  0xfd   :  { %455 = vmatpush3.msra.mxu1 %v18_v14 }
  0xfe   :  { %456 = vmatprep.subr.mxu1 %v495_v1 }
  0xff   :  { %457 = vmatpush3.msra.mxu1 %v17_v15 }
 0x100   :  { %458 = vmatprep.subr.mxu1 %v495_v1 }
 0x101   :  { %459 = vmatpush3.msra.mxu1 %v16_v16 }
 0x1a2   :  { %v177_v21 = vpop.f32.mrf.mxu1 }
 0x1a3   :  { %v181_v22 = vmul.f32 0.03125, %v177_v21 }
 0x1a4   :  { %v427_v23 = vpop.f32.mrf.mxu1 }
 0x1a5   :  { %v182_v24 = vsub.f32 %v15_v17, %v181_v22 }
 0x1a7   :  { %v183_v25 = vmul.f32 %v182_v24, %v182_v24 }
 0x1a9   :  { %461 = vmatmul.mubr.f32.vlgmr.msra.gmra.mxu1 %v183_v25 }
 0x269   :  { %v250_v26 = vpop.f32.mrf.mxu1 }
 0x26a   :  { %466 = vmatmul.mubr.msk.f32.vlgmr.msra.gmra.mxu0 %vm103_vm2, %v250_v26 }
 0x26b   :  { %v462_v27 = vpop.f32.mrf.mxu1 }
 0x32a   :  { %v323_v28 = vpop.f32.mrf.mxu0 }
 0x32b   :  { %v327_v29 = vmul.f32 0.03125, %v323_v28 }
 0x32c   :  { %v467_v30 = vpop.f32.mrf.mxu0 }
 0x32d   :  { %v328_v31 = vadd.f32 1e-05, %v327_v29 }
 0x32f   :  { %471 = vrsqrt.f32 %v328_v31 }
 0x33c   :  { %v472_v32 = vpop.eup %471 }
 0x33d   :  { %v330_v33 = vmul.f32 %v472_v32, %v182_v24 }
 0x33f   :  { %331 = vst [vmem:[#allocation2] sm:$0xf] %v330_v33 }
 0x340   :  { %484 = shalt.err (!%p481_p4)
}
 0x341   :  { %341 = dma.vmem_to_hbm [thread:$0]  %s339_s1, 64, %s630_s3, [#allocation3]  }
 0x342   :  { %493 = dma.done.wait [#allocation3], 64  }
 0x343   :  { %494 = vsyncadd [#allocation3], 4294967232 }
 0x344   :  { %345 = vsyncpa [#allocation3], 1 }

// kernel: tpu_custom_call.1
= control target key start
LH: loop header
LB: loop body
LE: loop exit
PB: predicated region body
PF: predicated region fallthrough
CT: control target
= control target key end

     0   :  { %6 = vsyncpa [#allocation3], 0  ;;  %s156_s0 = inlined_call_operand.hbm [shape: f32[16,32], index: 0, kind: input, shape index: {}]   ;;  %s157_s1 = inlined_call_operand.hbm [shape: f32[16,32], index: 1, kind: output, shape index: {}]  }
   0x1   :  { %7 = vsyncpa [#allocation4], 0  ;;  %s124_s6 = smov [#allocation2]  }
   0x2   :  { %s13_s7 = sshll.u32 %s124_s6, 4  ;;  %s14_s7 = int_to_ptr.vmem [resolvable:$true] %s13_s7 }
   0x3   :  { %s88_s8 = scalar_lea.vmem %s14_s7, 256  ;;  %p93_p1 = scmp.lt.s32.totalorder %s14_s7, %s14_s7 }
   0x4   :  { %p89_p0 = scmp.ne.s32.totalorder %s14_s7, %s88_s8  ;;  %p94_p2 = scmp.lt.s32.totalorder %s88_s8, %s88_s8 }
   0x6   :  { %p95_p3 = por %p94_p2, %p93_p1 }
   0x8   :  { %p96_p4 = pnand %p95_p3, %p89_p0 }
   0xa   :  { %99 = shalt.err (!%p96_p4)
}
   0xb   :  { %s125_s9 = smov 128   ;;  %s126_s10 = smov 8  }
   0xc   :  { %19 = dma.hbm_to_vmem [thread:$0]  %s156_s0, 256, %s14_s7, [#allocation3], %s125_s9, %s125_s9, %s126_s10  }
   0xd   :  { %120 = dma.done.wait [#allocation3], 256  }
   0xe   :  { %121 = vsyncadd [#allocation3], 4294967040  ;;  %vm25_vm0 = vcmask 261120   ;;  %v23_v0 = vld [vmem:[#allocation2] sm:$0xff]  ;;  %v24_v1 = vld [vmem:[#allocation2 + $0x8] sm:$0xff]  ;;  %s127_s0 = smov [#allocation5]  }
   0xf   :  { %v26_v2 = vsel %vm25_vm0, %v23_v0, 0.0  ;;  %v29_v3 = vsel %vm25_vm0, %v24_v1, 0.0  ;;  %s60_s13 = sshll.u32 %s127_s0, 4  ;;  %s61_s13 = int_to_ptr.vmem [resolvable:$true] %s60_s13 }
  0x10   :  { %27 = vadd.xlane.f32.xlu0 %v26_v2  ;;  %s100_s14 = scalar_lea.vmem %s61_s13, 256  ;;  %p105_p6 = scmp.lt.s32.totalorder %s61_s13, %s61_s13 }
  0x11   :  { %p101_p5 = scmp.ne.s32.totalorder %s61_s13, %s100_s14  ;;  %p106_p7 = scmp.lt.s32.totalorder %s100_s14, %s100_s14 }
  0x13   :  { %p107_p8 = por %p106_p7, %p105_p6 }
  0x14   :  { %30 = vadd.xlane.f32.xlu0 %v29_v3 }
  0x15   :  { %p108_p9 = pnand %p107_p8, %p101_p5 }
  0x99   :  { %v28_v4 = vpop.xlane.xlu0 %27 }
  0x9a   :  { %v33_v5 = vmul.f32 0.03125, %v28_v4 }
  0x9c   :  { %v35_v6 = vsub.f32 %v23_v0, %v33_v5 }
  0x9d   :  { %v31_v7 = vpop.xlane.xlu0 %30 }
  0x9e   :  { %v34_v8 = vmul.f32 0.03125, %v31_v7  ;;  %v37_v9 = vmul.f32 %v35_v6, %v35_v6 }
  0xa0   :  { %v36_v10 = vsub.f32 %v24_v1, %v34_v8  ;;  %v39_v11 = vsel %vm25_vm0, %v37_v9, 0.0 }
  0xa1   :  { %40 = vadd.xlane.f32.xlu1 %v39_v11 }
  0xa2   :  { %v38_v12 = vmul.f32 %v36_v10, %v36_v10 }
  0xa4   :  { %v42_v13 = vsel %vm25_vm0, %v38_v12, 0.0 }
  0xa5   :  { %43 = vadd.xlane.f32.xlu1 %v42_v13 }
 0x12a   :  { %v41_v14 = vpop.xlane.xlu1 %40 }
 0x12b   :  { %v45_v15 = vmul.f32 0.03125, %v41_v14 }
 0x12d   :  { %v47_v16 = vadd.f32 1e-05, %v45_v15 }
 0x12e   :  { %v44_v17 = vpop.xlane.xlu1 %43 }
 0x12f   :  { %76 = vrsqrt.f32 %v47_v16  ;;  %v46_v18 = vmul.f32 0.03125, %v44_v17 }
 0x131   :  { %v48_v19 = vadd.f32 1e-05, %v46_v18 }
 0x133   :  { %78 = vrsqrt.f32 %v48_v19 }
 0x13c   :  { %v77_v20 = vpop.eup %76 }
 0x13d   :  { %v51_v21 = vmul.f32 %v77_v20, %v35_v6 }
 0x13f   :  { %53 = vst.msk [vmem:[#allocation5] sm:$0xff] %vm25_vm0, %v51_v21 }
 0x140   :  { %v79_v22 = vpop.eup %78 }
 0x141   :  { %v52_v23 = vmul.f32 %v79_v22, %v36_v10 }
 0x143   :  { %54 = vst.msk [vmem:[#allocation5 + $0x8] sm:$0xff] %vm25_vm0, %v52_v23 }
 0x144   :  { %111 = shalt.err (!%p108_p9)
}
 0x145   :  { %66 = dma.vmem_to_hbm [thread:$0]  %s61_s13, 256, %s157_s1, [#allocation4], %s125_s9, %s125_s9, %s126_s10  }
 0x146   :  { %122 = dma.done.wait [#allocation4], 256  }
 0x147   :  { %123 = vsyncadd [#allocation4], 4294967040 }
 0x148   :  { %70 = vsyncpa [#allocation3], 1 }
 0x149   :  { %71 = vsyncpa [#allocation4], 1 }

</bundles_post_ra>
